<compile_context>
chip_gen: v7x
topology: tpu7x:2x2x1
jax: 0.10.0
libtpu: 0.0.40
codegen_flags: <defaults>
</compile_context>

<pallas_src>
import functools
import math

import jax
import jax.numpy as jnp
from jax.experimental import pallas as pl
from jax.experimental.pallas import tpu as pltpu


# ----------------------------- model config (small, synthetic) ---------------
B = 2            # batch
S = 8            # sequence length
H = 32           # hidden size (real)
NH = 2           # attention heads
HD = H // NH     # head dim (real)
FF = 64          # FFN intermediate (real)
L = 2            # transformer layers
VOCAB = 50
NUM_CLASSES = 3
LN_EPS = 1e-12

# ----------------------------- lane-dense padded sizes -----------------------
HP = 128          # padded hidden (lane-dense)
HDP = 128         # padded per-head dim (full-width MXU contraction)
AP = NH * HDP     # padded q/k/v width
FFP = 128         # padded FFN intermediate
CP = 128          # padded classifier output


# ----------------------------- shared math helpers ---------------------------
def _gelu_tanh(x):
    # TODO(synk): HF BERT default is exact erf-GELU; tanh approximation used here.
    return 0.5 * x * (1.0 + jnp.tanh(0.7978845608028654
                                     * (x + 0.044715 * x * x * x)))


def _masked_layernorm(x, g, b, lane_mask):
    # x: (..., HP) with padded lanes exactly 0; statistics over the real H lanes.
    mu = jnp.sum(x, axis=-1, keepdims=True) * (1.0 / H)
    xc = (x - mu) * lane_mask
    var = jnp.sum(xc * xc, axis=-1, keepdims=True) * (1.0 / H)
    return xc * jax.lax.rsqrt(var + LN_EPS) * g + b


# ----------------------------- fused Pallas kernel ---------------------------
def bert_fused_kernel(emb_ref, mask_ref,
                      qkvw_ref, qkvb_ref, wo_ref, bo_ref, ln1g_ref, ln1b_ref,
                      w1_ref, b1_ref, w2_ref, b2_ref, ln2g_ref, ln2b_ref,
                      embg_ref, embb_ref, poolw_ref, poolb_ref, clsw_ref, clsb_ref,
                      hid_ref, scores_ref, *, use_pooler):
    l = pl.program_id(0)

    lane = jax.lax.broadcasted_iota(jnp.int32, (1, 1, HP), 2)
    lane_mask = (lane < H).astype(jnp.float32)

    # ---- first grid step: embedding LayerNorm initializes the resident hidden ----
    @pl.when(l == 0)
    def _():
        hid_ref[...] = _masked_layernorm(emb_ref[...], embg_ref[...],
                                         embb_ref[...], lane_mask)
        scores_ref[...] = jnp.zeros_like(scores_ref)

    h = hid_ref[...]                                        # (B, S, HP) f32, resident
    h2b = h.reshape(B * S, HP).astype(jnp.bfloat16)

    # ---- fused QKV projection (bf16 MXU, f32 accumulation) ----
    qkv = jnp.dot(h2b, qkvw_ref[...],
                  preferred_element_type=jnp.float32) + qkvb_ref[...]   # (B*S, 3*AP)

    def to_heads(x2, base):
        # lane-aligned 128-wide head blocks -> leading batch dim, order (head, batch)
        parts = [x2[:, base + hh * HDP: base + (hh + 1) * HDP] for hh in range(NH)]
        return jnp.stack(parts, axis=0).reshape(NH * B, S, HDP).astype(jnp.bfloat16)

    def from_heads(ctx):
        # (NH*B, S, HDP) -> (B*S, AP), head hh occupies lanes [hh*HDP, (hh+1)*HDP)
        c = ctx.reshape(NH, B * S, HDP)
        return jnp.concatenate([c[hh] for hh in range(NH)], axis=-1)

    qh = to_heads(qkv, 0)
    kh = to_heads(qkv, AP)
    vh = to_heads(qkv, 2 * AP)

    # ---- all heads in one batched contraction ----
    sc = jnp.einsum('bqd,bkd->bqk', qh, kh,
                    preferred_element_type=jnp.float32) * (1.0 / math.sqrt(HD))
    sc = sc + mask_ref[...]                                  # (NH*B, 1, S) additive mask
    sc = sc - jnp.max(sc, axis=-1, keepdims=True)
    p = jnp.exp(sc)
    p = p * pl.reciprocal(jnp.sum(p, axis=-1, keepdims=True), approx=True)

    ctx = jnp.einsum('bqk,bkd->bqd', p.astype(jnp.bfloat16), vh,
                     preferred_element_type=jnp.float32)     # (NH*B, S, HDP)
    ctx2 = from_heads(ctx).astype(jnp.bfloat16)              # (B*S, AP)

    attn = (jnp.dot(ctx2, wo_ref[...],
                    preferred_element_type=jnp.float32)
            + bo_ref[...]).reshape(B, S, HP)
    x1 = _masked_layernorm(h + attn, ln1g_ref[...], ln1b_ref[...], lane_mask)

    # ---- feed forward ----
    x1b = x1.reshape(B * S, HP).astype(jnp.bfloat16)
    hdn = jnp.dot(x1b, w1_ref[...], preferred_element_type=jnp.float32) + b1_ref[...]
    hdn = _gelu_tanh(hdn)
    ffn = (jnp.dot(hdn.astype(jnp.bfloat16), w2_ref[...],
                   preferred_element_type=jnp.float32)
           + b2_ref[...]).reshape(B, S, HP)
    new_h = _masked_layernorm(x1 + ffn, ln2g_ref[...], ln2b_ref[...], lane_mask)

    hid_ref[...] = new_h

    # ---- last grid step: CLS pooler + classifier fused in ----
    @pl.when(l == L - 1)
    def _():
        cls = new_h[:, 0, :]                                 # (B, HP)
        if use_pooler:
            pooled = jnp.tanh(
                jnp.dot(cls.astype(jnp.bfloat16), poolw_ref[...],
                        preferred_element_type=jnp.float32) + poolb_ref[...])
        else:
            pooled = cls                                     # 'bert_mlp': no pooler
        scores_ref[...] = (jnp.dot(pooled.astype(jnp.bfloat16), clsw_ref[...],
                                   preferred_element_type=jnp.float32)
                           + clsb_ref[...])


def _build_bert_call(use_pooler):
    kern = functools.partial(bert_fused_kernel, use_pooler=use_pooler)

    def full(shape):
        n = len(shape)
        return pl.BlockSpec(shape, lambda l: (0,) * n)

    def per_layer(shape):
        n = len(shape)
        return pl.BlockSpec((None,) + shape, lambda l: (l,) + (0,) * n)

    in_specs = [
        full((B, S, HP)),            # padded embeddings
        full((NH * B, 1, S)),        # additive attention mask (per head,batch)
        per_layer((HP, 3 * AP)),     # fused QKV weight (bf16)
        per_layer((1, 3 * AP)),      # fused QKV bias
        per_layer((AP, HP)),         # attention output weight (bf16)
        per_layer((1, HP)),          # attention output bias
        per_layer((1, HP)),          # LN1 gamma
        per_layer((1, HP)),          # LN1 beta
        per_layer((HP, FFP)),        # FFN up weight (bf16)
        per_layer((1, FFP)),         # FFN up bias
        per_layer((FFP, HP)),        # FFN down weight (bf16)
        per_layer((1, HP)),          # FFN down bias
        per_layer((1, HP)),          # LN2 gamma
        per_layer((1, HP)),          # LN2 beta
        full((1, HP)),               # embedding LN gamma
        full((1, HP)),               # embedding LN beta
        full((HP, HP)),              # pooler weight (bf16)
        full((1, HP)),               # pooler bias
        full((HP, CP)),              # classifier weight (bf16)
        full((1, CP)),               # classifier bias
    ]
    out_specs = [full((B, S, HP)),   # hidden state, resident across layer axis
                 full((B, CP))]      # padded scores

    return pl.pallas_call(
        kern,
        grid_spec=pltpu.PrefetchScalarGridSpec(
            num_scalar_prefetch=0,
            grid=(L,),
            in_specs=in_specs,
            out_specs=out_specs),
        out_shape=(jax.ShapeDtypeStruct((B, S, HP), jnp.float32),
                   jax.ShapeDtypeStruct((B, CP), jnp.float32)),
        compiler_params=pltpu.CompilerParams(
            dimension_semantics=("arbitrary",),      # layers are sequential
            vmem_limit_bytes=64 * 1024 * 1024),
    )


# ----------------------------- parameters ------------------------------------
def init_params(key):
    """Real-sized (unpadded) parameters mirroring the torch module."""
    def nrm(k, shape, scale=0.02):
        return (scale * jax.random.normal(k, shape)).astype(jnp.float32)

    keys = list(jax.random.split(key, 5 + 6 * L))
    ki = iter(keys)
    real = {
        'word_emb': nrm(next(ki), (VOCAB, H)),
        'pos_emb': nrm(next(ki), (S, H)),
        'type_emb': nrm(next(ki), (2, H)),
        'emb_ln_g': jnp.ones((H,), jnp.float32),
        'emb_ln_b': jnp.zeros((H,), jnp.float32),
        'pooler_w': nrm(next(ki), (H, H)),
        'pooler_b': jnp.zeros((H,), jnp.float32),
        'cls_w': nrm(next(ki), (H, NUM_CLASSES)),
        'cls_b': jnp.zeros((NUM_CLASSES,), jnp.float32),
        'layers': [],
    }
    for _ in range(L):
        real['layers'].append({
            'wq': nrm(next(ki), (H, H)), 'bq': jnp.zeros((H,), jnp.float32),
            'wk': nrm(next(ki), (H, H)), 'bk': jnp.zeros((H,), jnp.float32),
            'wv': nrm(next(ki), (H, H)), 'bv': jnp.zeros((H,), jnp.float32),
            'wo': nrm(next(ki), (H, H)), 'bo': jnp.zeros((H,), jnp.float32),
            'ln1g': jnp.ones((H,), jnp.float32), 'ln1b': jnp.zeros((H,), jnp.float32),
            'w1': nrm(next(ki), (H, FF)), 'b1': jnp.zeros((FF,), jnp.float32),
            'w2': nrm(next(ki), (FF, H)), 'b2': jnp.zeros((H,), jnp.float32),
            'ln2g': jnp.ones((H,), jnp.float32), 'ln2b': jnp.zeros((H,), jnp.float32),
        })
    return real


def _pad2(w, rows, cols):
    return jnp.zeros((rows, cols), jnp.float32).at[:w.shape[0], :w.shape[1]].set(w)


def _pad1(v, n):
    return jnp.zeros((n,), jnp.float32).at[:v.shape[0]].set(v)


def prepare_params(real):
    """Lane-dense zero-padding (head-aware for QKV/WO), layer stacking, bf16 weights."""
    def headify_proj(w, b):
        # (H,H) -> (HP, AP): head hh's real HD cols live at lanes [hh*HDP, hh*HDP+HD)
        wp = jnp.zeros((HP, AP), jnp.float32)
        bp = jnp.zeros((AP,), jnp.float32)
        for hh in range(NH):
            wp = wp.at[:H, hh * HDP:hh * HDP + HD].set(w[:, hh * HD:(hh + 1) * HD])
            bp = bp.at[hh * HDP:hh * HDP + HD].set(b[hh * HD:(hh + 1) * HD])
        return wp, bp

    def headify_out(w):
        # (H,H) -> (AP, HP): rows match the head-aware context layout
        wp = jnp.zeros((AP, HP), jnp.float32)
        for hh in range(NH):
            wp = wp.at[hh * HDP:hh * HDP + HD, :H].set(w[hh * HD:(hh + 1) * HD, :])
        return wp

    qkv_w, qkv_b, wo, bo = [], [], [], []
    ln1g, ln1b, w1, b1, w2, b2, ln2g, ln2b = [], [], [], [], [], [], [], []
    for lp in real['layers']:
        wq, bq = headify_proj(lp['wq'], lp['bq'])
        wk, bk = headify_proj(lp['wk'], lp['bk'])
        wv, bv = headify_proj(lp['wv'], lp['bv'])
        qkv_w.append(jnp.concatenate([wq, wk, wv], axis=1))       # (HP, 3*AP)
        qkv_b.append(jnp.concatenate([bq, bk, bv])[None, :])      # (1, 3*AP)
        wo.append(headify_out(lp['wo']))
        bo.append(_pad1(lp['bo'], HP)[None, :])
        ln1g.append(_pad1(lp['ln1g'], HP)[None, :])
        ln1b.append(_pad1(lp['ln1b'], HP)[None, :])
        w1.append(_pad2(lp['w1'], HP, FFP))
        b1.append(_pad1(lp['b1'], FFP)[None, :])
        w2.append(_pad2(lp['w2'], FFP, HP))
        b2.append(_pad1(lp['b2'], HP)[None, :])
        ln2g.append(_pad1(lp['ln2g'], HP)[None, :])
        ln2b.append(_pad1(lp['ln2b'], HP)[None, :])

    return {
        'word_emb': real['word_emb'],
        'pos_emb': real['pos_emb'],
        'type_emb': real['type_emb'],
        'qkv_w': jnp.stack(qkv_w).astype(jnp.bfloat16),
        'qkv_b': jnp.stack(qkv_b),
        'wo': jnp.stack(wo).astype(jnp.bfloat16),
        'bo': jnp.stack(bo),
        'ln1g': jnp.stack(ln1g), 'ln1b': jnp.stack(ln1b),
        'w1': jnp.stack(w1).astype(jnp.bfloat16), 'b1': jnp.stack(b1),
        'w2': jnp.stack(w2).astype(jnp.bfloat16), 'b2': jnp.stack(b2),
        'ln2g': jnp.stack(ln2g), 'ln2b': jnp.stack(ln2b),
        'emb_g': _pad1(real['emb_ln_g'], HP)[None, :],
        'emb_b': _pad1(real['emb_ln_b'], HP)[None, :],
        'pool_w': _pad2(real['pooler_w'], HP, HP).astype(jnp.bfloat16),
        'pool_b': _pad1(real['pooler_b'], HP)[None, :],
        'cls_w': _pad2(real['cls_w'], HP, CP).astype(jnp.bfloat16),
        'cls_b': _pad1(real['cls_b'], CP)[None, :],
    }


# ----------------------------- full BERT forward ------------------------------
@functools.partial(jax.jit, static_argnames=('model_name',))
def bert_forward(dev, input_ids, attention_mask, model_name='bert'):
    if model_name in ('bert', 'bert_lo'):
        use_pooler = True
    elif model_name == 'bert_mlp':
        use_pooler = False
    else:
        raise TypeError(model_name)

    # embeddings (gathers stay in plain JAX glue); token_type_ids fixed to segment 0
    tok = jnp.take(dev['word_emb'], input_ids, axis=0)              # (B, S, H)
    emb = tok + dev['pos_emb'][None, :, :] + dev['type_emb'][0][None, None, :]
    emb_p = jnp.zeros((B, S, HP), jnp.float32).at[:, :, :H].set(emb)

    # additive attention mask, per (head, batch): (NH*B, 1, S)
    neg = (1.0 - attention_mask.astype(jnp.float32)) * -10000.0     # (B, S)
    mask_add = jnp.broadcast_to(neg[None, :, None, :],
                                (NH, B, 1, S)).reshape(NH * B, 1, S)

    call = _build_bert_call(use_pooler)
    hidden_p, scores_p = call(
        emb_p, mask_add,
        dev['qkv_w'], dev['qkv_b'], dev['wo'], dev['bo'],
        dev['ln1g'], dev['ln1b'], dev['w1'], dev['b1'],
        dev['w2'], dev['b2'], dev['ln2g'], dev['ln2b'],
        dev['emb_g'], dev['emb_b'], dev['pool_w'], dev['pool_b'],
        dev['cls_w'], dev['cls_b'])

    cls_repr = hidden_p[:, 0, :H]
    scores = scores_p[:, :NUM_CLASSES]
    return cls_repr, scores


# ----------------------------- plain-JAX reference (f32) ----------------------
def bert_reference(real, input_ids, attention_mask, model_name='bert'):
    def ln(x, g, b):
        mu = jnp.mean(x, axis=-1, keepdims=True)
        var = jnp.mean((x - mu) ** 2, axis=-1, keepdims=True)
        return (x - mu) * jax.lax.rsqrt(var + LN_EPS) * g + b

    tok = jnp.take(real['word_emb'], input_ids, axis=0)
    h = tok + real['pos_emb'][None, :, :] + real['type_emb'][0][None, None, :]
    h = ln(h, real['emb_ln_g'], real['emb_ln_b'])
    mask4 = ((1.0 - attention_mask.astype(jnp.float32)) * -10000.0)[:, None, None, :]
    for lp in real['layers']:
        x2 = h.reshape(B * S, H)
        q = (x2 @ lp['wq'] + lp['bq']).reshape(B, S, NH, HD)
        k = (x2 @ lp['wk'] + lp['bk']).reshape(B, S, NH, HD)
        v = (x2 @ lp['wv'] + lp['bv']).reshape(B, S, NH, HD)
        sc = jnp.einsum('bqhd,bkhd->bhqk', q, k) / math.sqrt(HD) + mask4
        p = jax.nn.softmax(sc, axis=-1)
        ctx = jnp.einsum('bhqk,bkhd->bqhd', p, v).reshape(B * S, H)
        attn = (ctx @ lp['wo'] + lp['bo']).reshape(B, S, H)
        h = ln(h + attn, lp['ln1g'], lp['ln1b'])
        x2 = h.reshape(B * S, H)
        hdn = _gelu_tanh(x2 @ lp['w1'] + lp['b1'])
        ffn = (hdn @ lp['w2'] + lp['b2']).reshape(B, S, H)
        h = ln(h + ffn, lp['ln2g'], lp['ln2b'])
    cls = h[:, 0, :]
    if model_name in ('bert', 'bert_lo'):
        pooled = jnp.tanh(cls @ real['pooler_w'] + real['pooler_b'])
    else:
        pooled = cls
    return cls, pooled @ real['cls_w'] + real['cls_b']


if __name__ == "__main__":
    key = jax.random.PRNGKey(0)
    pkey, ikey = jax.random.split(key)

    real = init_params(pkey)
    dev = prepare_params(real)

    input_ids = jax.random.randint(ikey, (B, S), 0, VOCAB, dtype=jnp.int32)
    attention_mask = jnp.ones((B, S), dtype=jnp.int32).at[1, 6:].set(0)  # pad row 1

    cls_repr, scores = bert_forward(dev, input_ids, attention_mask, model_name='bert')
    jax.block_until_ready((cls_repr, scores))

    assert cls_repr.shape == (B, H)
    assert scores.shape == (B, NUM_CLASSES)
    assert bool(jnp.all(jnp.isfinite(cls_repr))) and bool(jnp.all(jnp.isfinite(scores)))

    # sanity check vs a plain f32 JAX reference (loose tolerance: bf16 MXU inputs)
    ref_cls, ref_scores = bert_reference(real, input_ids, attention_mask, 'bert')
    assert float(jnp.max(jnp.abs(cls_repr - ref_cls))) < 0.25
    assert float(jnp.max(jnp.abs(scores - ref_scores))) < 0.25

    print("KERNEL_OK")
</pallas_src>

<mosaic_0001>
module attributes {stable_mosaic.version = 11 : i64} {
  func.func @bert_fused_kernel(%arg0: i32, %arg1: memref<2x8x128xf32, #tpu.memory_space<vmem>>, %arg2: memref<4x1x8xf32, #tpu.memory_space<vmem>>, %arg3: memref<1x128x768xbf16, #tpu.memory_space<vmem>>, %arg4: memref<1x1x768xf32, #tpu.memory_space<vmem>>, %arg5: memref<1x256x128xbf16, #tpu.memory_space<vmem>>, %arg6: memref<1x1x128xf32, #tpu.memory_space<vmem>>, %arg7: memref<1x1x128xf32, #tpu.memory_space<vmem>>, %arg8: memref<1x1x128xf32, #tpu.memory_space<vmem>>, %arg9: memref<1x128x128xbf16, #tpu.memory_space<vmem>>, %arg10: memref<1x1x128xf32, #tpu.memory_space<vmem>>, %arg11: memref<1x128x128xbf16, #tpu.memory_space<vmem>>, %arg12: memref<1x1x128xf32, #tpu.memory_space<vmem>>, %arg13: memref<1x1x128xf32, #tpu.memory_space<vmem>>, %arg14: memref<1x1x128xf32, #tpu.memory_space<vmem>>, %arg15: memref<1x128xf32, #tpu.memory_space<vmem>>, %arg16: memref<1x128xf32, #tpu.memory_space<vmem>>, %arg17: memref<128x128xbf16, #tpu.memory_space<vmem>>, %arg18: memref<1x128xf32, #tpu.memory_space<vmem>>, %arg19: memref<128x128xbf16, #tpu.memory_space<vmem>>, %arg20: memref<1x128xf32, #tpu.memory_space<vmem>>, %arg21: memref<2x8x128xf32, #tpu.memory_space<vmem>>, %arg22: memref<2x128xf32, #tpu.memory_space<vmem>>) attributes {dimension_semantics = [#tpu.dimension_semantics<arbitrary>], iteration_bounds = array<i64: 2>, scalar_prefetch = 0 : i64, scratch_operands = 0 : i64, tpu.core_type = #tpu.core_type<tc>, window_params = [{pipeline_mode = #tpu.pipeline_mode<synchronous>, transform_indices = @transform_0, window_bounds = array<i64: 2, 8, 128>}, {pipeline_mode = #tpu.pipeline_mode<synchronous>, transform_indices = @transform_1, window_bounds = array<i64: 4, 1, 8>}, {transform_indices = @transform_2, window_bounds = array<i64: 1, 128, 768>}, {transform_indices = @transform_3, window_bounds = array<i64: 1, 1, 768>}, {transform_indices = @transform_4, window_bounds = array<i64: 1, 256, 128>}, {transform_indices = @transform_5, window_bounds = array<i64: 1, 1, 128>}, {transform_indices = @transform_6, window_bounds = array<i64: 1, 1, 128>}, {transform_indices = @transform_7, window_bounds = array<i64: 1, 1, 128>}, {transform_indices = @transform_8, window_bounds = array<i64: 1, 128, 128>}, {transform_indices = @transform_9, window_bounds = array<i64: 1, 1, 128>}, {transform_indices = @transform_10, window_bounds = array<i64: 1, 128, 128>}, {transform_indices = @transform_11, window_bounds = array<i64: 1, 1, 128>}, {transform_indices = @transform_12, window_bounds = array<i64: 1, 1, 128>}, {transform_indices = @transform_13, window_bounds = array<i64: 1, 1, 128>}, {pipeline_mode = #tpu.pipeline_mode<synchronous>, transform_indices = @transform_14, window_bounds = array<i64: 1, 128>}, {pipeline_mode = #tpu.pipeline_mode<synchronous>, transform_indices = @transform_15, window_bounds = array<i64: 1, 128>}, {pipeline_mode = #tpu.pipeline_mode<synchronous>, transform_indices = @transform_16, window_bounds = array<i64: 128, 128>}, {pipeline_mode = #tpu.pipeline_mode<synchronous>, transform_indices = @transform_17, window_bounds = array<i64: 1, 128>}, {pipeline_mode = #tpu.pipeline_mode<synchronous>, transform_indices = @transform_18, window_bounds = array<i64: 128, 128>}, {pipeline_mode = #tpu.pipeline_mode<synchronous>, transform_indices = @transform_19, window_bounds = array<i64: 1, 128>}, {pipeline_mode = #tpu.pipeline_mode<synchronous>, transform_indices = @transform_20, window_bounds = array<i64: 2, 8, 128>}, {pipeline_mode = #tpu.pipeline_mode<synchronous>, transform_indices = @transform_21, window_bounds = array<i64: 2, 128>}]} {
    %0 = tpu.iota {dimensions = array<i32: 2>} : vector<1x1x128xi32>
    %c32_i32 = arith.constant 32 : i32
    %1 = vector.broadcast %c32_i32 : i32 to vector<1x1x128xi32>
    %2 = arith.cmpi slt, %0, %1 : vector<1x1x128xi32>
    %3 = arith.extui %2 : vector<1x1x128xi1> to vector<1x1x128xi32>
    %4 = arith.sitofp %3 : vector<1x1x128xi32> to vector<1x1x128xf32>
    %c0_i32 = arith.constant 0 : i32
    %5 = arith.cmpi eq, %arg0, %c0_i32 : i32
    %6 = arith.extui %5 : i1 to i32
    %c0_i32_0 = arith.constant 0 : i32
    %7 = arith.cmpi ne, %6, %c0_i32_0 : i32
    scf.if %7 {
      %c0_68 = arith.constant 0 : index
      %c0_69 = arith.constant 0 : index
      %c0_70 = arith.constant 0 : index
      %165 = vector.load %arg1[%c0_68, %c0_69, %c0_70] : memref<2x8x128xf32, #tpu.memory_space<vmem>>, vector<2x8x128xf32>
      %c0_71 = arith.constant 0 : index
      %c0_72 = arith.constant 0 : index
      %166 = vector.load %arg15[%c0_71, %c0_72] : memref<1x128xf32, #tpu.memory_space<vmem>>, vector<1x128xf32>
      %c0_73 = arith.constant 0 : index
      %c0_74 = arith.constant 0 : index
      %167 = vector.load %arg16[%c0_73, %c0_74] : memref<1x128xf32, #tpu.memory_space<vmem>>, vector<1x128xf32>
      %cst_75 = arith.constant dense<0.000000e+00> : vector<2x8xf32>
      %168 = vector.multi_reduction <add>, %165, %cst_75 [2] : vector<2x8x128xf32> to vector<2x8xf32>
      %169 = vector.shape_cast %168 : vector<2x8xf32> to vector<2x8x1xf32>
      %cst_76 = arith.constant 3.125000e-02 : f32
      %170 = vector.broadcast %cst_76 : f32 to vector<2x8x1xf32>
      %171 = arith.mulf %169, %170 : vector<2x8x1xf32>
      %172 = vector.broadcast %171 : vector<2x8x1xf32> to vector<2x8x128xf32>
      %173 = arith.subf %165, %172 : vector<2x8x128xf32>
      %174 = vector.broadcast %4 : vector<1x1x128xf32> to vector<2x8x128xf32>
      %175 = arith.mulf %173, %174 : vector<2x8x128xf32>
      %176 = arith.mulf %175, %175 : vector<2x8x128xf32>
      %cst_77 = arith.constant dense<0.000000e+00> : vector<2x8xf32>
      %177 = vector.multi_reduction <add>, %176, %cst_77 [2] : vector<2x8x128xf32> to vector<2x8xf32>
      %178 = vector.shape_cast %177 : vector<2x8xf32> to vector<2x8x1xf32>
      %cst_78 = arith.constant 3.125000e-02 : f32
      %179 = vector.broadcast %cst_78 : f32 to vector<2x8x1xf32>
      %180 = arith.mulf %178, %179 : vector<2x8x1xf32>
      %cst_79 = arith.constant 9.99999996E-13 : f32
      %181 = vector.broadcast %cst_79 : f32 to vector<2x8x1xf32>
      %182 = arith.addf %180, %181 : vector<2x8x1xf32>
      %183 = math.rsqrt %182 : vector<2x8x1xf32>
      %184 = vector.broadcast %183 : vector<2x8x1xf32> to vector<2x8x128xf32>
      %185 = arith.mulf %175, %184 : vector<2x8x128xf32>
      %186 = vector.shape_cast %166 : vector<1x128xf32> to vector<1x1x128xf32>
      %187 = vector.broadcast %186 : vector<1x1x128xf32> to vector<2x8x128xf32>
      %188 = arith.mulf %185, %187 : vector<2x8x128xf32>
      %189 = vector.shape_cast %167 : vector<1x128xf32> to vector<1x1x128xf32>
      %190 = vector.broadcast %189 : vector<1x1x128xf32> to vector<2x8x128xf32>
      %191 = arith.addf %188, %190 : vector<2x8x128xf32>
      %c0_80 = arith.constant 0 : index
      %c0_81 = arith.constant 0 : index
      %c0_82 = arith.constant 0 : index
      %192 = vector.load %arg21[%c0_80, %c0_81, %c0_82] : memref<2x8x128xf32, #tpu.memory_space<vmem>>, vector<2x8x128xf32>
      tpu.vector_store %arg21[%c0_80, %c0_81, %c0_82], %191 {strides = array<i32>} : memref<2x8x128xf32, #tpu.memory_space<vmem>>, vector<2x8x128xf32>,
      %cst_83 = arith.constant 0.000000e+00 : f32
      %193 = vector.broadcast %cst_83 : f32 to vector<2x128xf32>
      %c0_84 = arith.constant 0 : index
      %c0_85 = arith.constant 0 : index
      %194 = vector.load %arg22[%c0_84, %c0_85] : memref<2x128xf32, #tpu.memory_space<vmem>>, vector<2x128xf32>
      tpu.vector_store %arg22[%c0_84, %c0_85], %193 {strides = array<i32>} : memref<2x128xf32, #tpu.memory_space<vmem>>, vector<2x128xf32>,
    } else {
    }
    %c0 = arith.constant 0 : index
    %c0_1 = arith.constant 0 : index
    %c0_2 = arith.constant 0 : index
    %8 = vector.load %arg21[%c0, %c0_1, %c0_2] : memref<2x8x128xf32, #tpu.memory_space<vmem>>, vector<2x8x128xf32>
    %9 = vector.shape_cast %8 : vector<2x8x128xf32> to vector<16x128xf32>
    %10 = arith.truncf %9 : vector<16x128xf32> to vector<16x128xbf16>
    %c0_3 = arith.constant 0 : index
    %c0_4 = arith.constant 0 : index
    %c0_5 = arith.constant 0 : index
    %11 = vector.load %arg3[%c0_3, %c0_4, %c0_5] : memref<1x128x768xbf16, #tpu.memory_space<vmem>>, vector<1x128x768xbf16>
    %12 = vector.shape_cast %11 : vector<1x128x768xbf16> to vector<128x768xbf16>
    %cst = arith.constant dense<0.000000e+00> : vector<16x768xf32>
    %13 = tpu.matmul %10, %12, %cst {dimension_numbers = #tpu.dot_dimension_numbers<[1], [0], [0], [1], [0, 0, 1, 1], [], []>} : vector<16x128xbf16>, vector<128x768xbf16>, vector<16x768xf32> -> vector<16x768xf32>
    %c0_6 = arith.constant 0 : index
    %c0_7 = arith.constant 0 : index
    %c0_8 = arith.constant 0 : index
    %14 = vector.load %arg4[%c0_6, %c0_7, %c0_8] : memref<1x1x768xf32, #tpu.memory_space<vmem>>, vector<1x1x768xf32>
    %15 = vector.shape_cast %14 : vector<1x1x768xf32> to vector<1x768xf32>
    %16 = vector.broadcast %15 : vector<1x768xf32> to vector<16x768xf32>
    %17 = arith.addf %13, %16 : vector<16x768xf32>
    %18 = vector.extract_strided_slice %17 {offsets = [0, 0], sizes = [16, 128], strides = [1, 1]} : vector<16x768xf32> to vector<16x128xf32>
    %19 = vector.extract_strided_slice %17 {offsets = [0, 128], sizes = [16, 128], strides = [1, 1]} : vector<16x768xf32> to vector<16x128xf32>
    %20 = vector.shape_cast %18 : vector<16x128xf32> to vector<1x16x128xf32>
    %21 = vector.shape_cast %19 : vector<16x128xf32> to vector<1x16x128xf32>
    %22 = tpu.concatenate %20, %21 in 0 : vector<1x16x128xf32>, vector<1x16x128xf32> -> vector<2x16x128xf32>
    %23 = vector.shape_cast %22 : vector<2x16x128xf32> to vector<4x8x128xf32>
    %24 = arith.truncf %23 : vector<4x8x128xf32> to vector<4x8x128xbf16>
    %25 = vector.extract_strided_slice %17 {offsets = [0, 256], sizes = [16, 128], strides = [1, 1]} : vector<16x768xf32> to vector<16x128xf32>
    %26 = vector.extract_strided_slice %17 {offsets = [0, 384], sizes = [16, 128], strides = [1, 1]} : vector<16x768xf32> to vector<16x128xf32>
    %27 = vector.shape_cast %25 : vector<16x128xf32> to vector<1x16x128xf32>
    %28 = vector.shape_cast %26 : vector<16x128xf32> to vector<1x16x128xf32>
    %29 = tpu.concatenate %27, %28 in 0 : vector<1x16x128xf32>, vector<1x16x128xf32> -> vector<2x16x128xf32>
    %30 = vector.shape_cast %29 : vector<2x16x128xf32> to vector<4x8x128xf32>
    %31 = arith.truncf %30 : vector<4x8x128xf32> to vector<4x8x128xbf16>
    %32 = vector.extract_strided_slice %17 {offsets = [0, 512], sizes = [16, 128], strides = [1, 1]} : vector<16x768xf32> to vector<16x128xf32>
    %33 = vector.extract_strided_slice %17 {offsets = [0, 640], sizes = [16, 128], strides = [1, 1]} : vector<16x768xf32> to vector<16x128xf32>
    %34 = vector.shape_cast %32 : vector<16x128xf32> to vector<1x16x128xf32>
    %35 = vector.shape_cast %33 : vector<16x128xf32> to vector<1x16x128xf32>
    %36 = tpu.concatenate %34, %35 in 0 : vector<1x16x128xf32>, vector<1x16x128xf32> -> vector<2x16x128xf32>
    %37 = vector.shape_cast %36 : vector<2x16x128xf32> to vector<4x8x128xf32>
    %38 = arith.truncf %37 : vector<4x8x128xf32> to vector<4x8x128xbf16>
    "tpu.trace_start"() <{level = 10 : i32, message = "bqd,bkd->bqk"}> : () -> ()
    %cst_9 = arith.constant dense<0.000000e+00> : vector<4x8x8xf32>
    %39 = tpu.matmul %24, %31, %cst_9 {dimension_numbers = #tpu.dot_dimension_numbers<[2], [2], [1], [1], [0, 0, 0, 1, 1, 1], [0], [0]>} : vector<4x8x128xbf16>, vector<4x8x128xbf16>, vector<4x8x8xf32> -> vector<4x8x8xf32>
    "tpu.trace_stop"() : () -> ()
    %cst_10 = arith.constant 2.500000e-01 : f32
    %40 = vector.broadcast %cst_10 : f32 to vector<4x8x8xf32>
    %41 = arith.mulf %39, %40 : vector<4x8x8xf32>
    %c0_11 = arith.constant 0 : index
    %c0_12 = arith.constant 0 : index
    %c0_13 = arith.constant 0 : index
    %42 = vector.load %arg2[%c0_11, %c0_12, %c0_13] : memref<4x1x8xf32, #tpu.memory_space<vmem>>, vector<4x1x8xf32>
    %43 = vector.broadcast %42 : vector<4x1x8xf32> to vector<4x8x8xf32>
    %44 = arith.addf %41, %43 : vector<4x8x8xf32>
    %cst_14 = arith.constant dense<0xFF800000> : vector<4x8xf32>
    %45 = vector.multi_reduction <maximumf>, %44, %cst_14 [2] : vector<4x8x8xf32> to vector<4x8xf32>
    %46 = vector.shape_cast %45 : vector<4x8xf32> to vector<4x8x1xf32>
    %47 = vector.broadcast %46 : vector<4x8x1xf32> to vector<4x8x8xf32>
    %48 = arith.subf %44, %47 : vector<4x8x8xf32>
    %49 = math.exp %48 : vector<4x8x8xf32>
    %cst_15 = arith.constant dense<0.000000e+00> : vector<4x8xf32>
    %50 = vector.multi_reduction <add>, %49, %cst_15 [2] : vector<4x8x8xf32> to vector<4x8xf32>
    %51 = vector.shape_cast %50 : vector<4x8xf32> to vector<4x8x1xf32>
    %52 = tpu.reciprocal %51 {approx = true} : vector<4x8x1xf32> -> vector<4x8x1xf32>
    %53 = vector.broadcast %52 : vector<4x8x1xf32> to vector<4x8x8xf32>
    %54 = arith.mulf %49, %53 : vector<4x8x8xf32>
    %55 = arith.truncf %54 : vector<4x8x8xf32> to vector<4x8x8xbf16>
    "tpu.trace_start"() <{level = 10 : i32, message = "bqk,bkd->bqd"}> : () -> ()
    %cst_16 = arith.constant dense<0.000000e+00> : vector<4x8x128xf32>
    %56 = tpu.matmul %55, %38, %cst_16 {dimension_numbers = #tpu.dot_dimension_numbers<[2], [1], [1], [2], [0, 0, 0, 1, 1, 2], [0], [0]>} : vector<4x8x8xbf16>, vector<4x8x128xbf16>, vector<4x8x128xf32> -> vector<4x8x128xf32>
    "tpu.trace_stop"() : () -> ()
    %57 = vector.shape_cast %56 : vector<4x8x128xf32> to vector<2x16x128xf32>
    %58 = vector.extract_strided_slice %57 {offsets = [0, 0, 0], sizes = [1, 16, 128], strides = [1, 1, 1]} : vector<2x16x128xf32> to vector<1x16x128xf32>
    %59 = vector.shape_cast %58 : vector<1x16x128xf32> to vector<16x128xf32>
    %60 = vector.extract_strided_slice %57 {offsets = [1, 0, 0], sizes = [1, 16, 128], strides = [1, 1, 1]} : vector<2x16x128xf32> to vector<1x16x128xf32>
    %61 = vector.shape_cast %60 : vector<1x16x128xf32> to vector<16x128xf32>
    %62 = tpu.concatenate %59, %61 in 1 : vector<16x128xf32>, vector<16x128xf32> -> vector<16x256xf32>
    %63 = arith.truncf %62 : vector<16x256xf32> to vector<16x256xbf16>
    %c0_17 = arith.constant 0 : index
    %c0_18 = arith.constant 0 : index
    %c0_19 = arith.constant 0 : index
    %64 = vector.load %arg5[%c0_17, %c0_18, %c0_19] : memref<1x256x128xbf16, #tpu.memory_space<vmem>>, vector<1x256x128xbf16>
    %65 = vector.shape_cast %64 : vector<1x256x128xbf16> to vector<256x128xbf16>
    %cst_20 = arith.constant dense<0.000000e+00> : vector<16x128xf32>
    %66 = tpu.matmul %63, %65, %cst_20 {dimension_numbers = #tpu.dot_dimension_numbers<[1], [0], [0], [1], [0, 0, 1, 1], [], []>} : vector<16x256xbf16>, vector<256x128xbf16>, vector<16x128xf32> -> vector<16x128xf32>
    %c0_21 = arith.constant 0 : index
    %c0_22 = arith.constant 0 : index
    %c0_23 = arith.constant 0 : index
    %67 = vector.load %arg6[%c0_21, %c0_22, %c0_23] : memref<1x1x128xf32, #tpu.memory_space<vmem>>, vector<1x1x128xf32>
    %68 = vector.shape_cast %67 : vector<1x1x128xf32> to vector<1x128xf32>
    %69 = vector.broadcast %68 : vector<1x128xf32> to vector<16x128xf32>
    %70 = arith.addf %66, %69 : vector<16x128xf32>
    %71 = vector.shape_cast %70 : vector<16x128xf32> to vector<2x8x128xf32>
    %72 = arith.addf %8, %71 : vector<2x8x128xf32>
    %c0_24 = arith.constant 0 : index
    %c0_25 = arith.constant 0 : index
    %c0_26 = arith.constant 0 : index
    %73 = vector.load %arg7[%c0_24, %c0_25, %c0_26] : memref<1x1x128xf32, #tpu.memory_space<vmem>>, vector<1x1x128xf32>
    %74 = vector.shape_cast %73 : vector<1x1x128xf32> to vector<1x128xf32>
    %c0_27 = arith.constant 0 : index
    %c0_28 = arith.constant 0 : index
    %c0_29 = arith.constant 0 : index
    %75 = vector.load %arg8[%c0_27, %c0_28, %c0_29] : memref<1x1x128xf32, #tpu.memory_space<vmem>>, vector<1x1x128xf32>
    %76 = vector.shape_cast %75 : vector<1x1x128xf32> to vector<1x128xf32>
    %cst_30 = arith.constant dense<0.000000e+00> : vector<2x8xf32>
    %77 = vector.multi_reduction <add>, %72, %cst_30 [2] : vector<2x8x128xf32> to vector<2x8xf32>
    %78 = vector.shape_cast %77 : vector<2x8xf32> to vector<2x8x1xf32>
    %cst_31 = arith.constant 3.125000e-02 : f32
    %79 = vector.broadcast %cst_31 : f32 to vector<2x8x1xf32>
    %80 = arith.mulf %78, %79 : vector<2x8x1xf32>
    %81 = vector.broadcast %80 : vector<2x8x1xf32> to vector<2x8x128xf32>
    %82 = arith.subf %72, %81 : vector<2x8x128xf32>
    %83 = vector.broadcast %4 : vector<1x1x128xf32> to vector<2x8x128xf32>
    %84 = arith.mulf %82, %83 : vector<2x8x128xf32>
    %85 = arith.mulf %84, %84 : vector<2x8x128xf32>
    %cst_32 = arith.constant dense<0.000000e+00> : vector<2x8xf32>
    %86 = vector.multi_reduction <add>, %85, %cst_32 [2] : vector<2x8x128xf32> to vector<2x8xf32>
    %87 = vector.shape_cast %86 : vector<2x8xf32> to vector<2x8x1xf32>
    %cst_33 = arith.constant 3.125000e-02 : f32
    %88 = vector.broadcast %cst_33 : f32 to vector<2x8x1xf32>
    %89 = arith.mulf %87, %88 : vector<2x8x1xf32>
    %cst_34 = arith.constant 9.99999996E-13 : f32
    %90 = vector.broadcast %cst_34 : f32 to vector<2x8x1xf32>
    %91 = arith.addf %89, %90 : vector<2x8x1xf32>
    %92 = math.rsqrt %91 : vector<2x8x1xf32>
    %93 = vector.broadcast %92 : vector<2x8x1xf32> to vector<2x8x128xf32>
    %94 = arith.mulf %84, %93 : vector<2x8x128xf32>
    %95 = vector.shape_cast %74 : vector<1x128xf32> to vector<1x1x128xf32>
    %96 = vector.broadcast %95 : vector<1x1x128xf32> to vector<2x8x128xf32>
    %97 = arith.mulf %94, %96 : vector<2x8x128xf32>
    %98 = vector.shape_cast %76 : vector<1x128xf32> to vector<1x1x128xf32>
    %99 = vector.broadcast %98 : vector<1x1x128xf32> to vector<2x8x128xf32>
    %100 = arith.addf %97, %99 : vector<2x8x128xf32>
    %101 = vector.shape_cast %100 : vector<2x8x128xf32> to vector<16x128xf32>
    %102 = arith.truncf %101 : vector<16x128xf32> to vector<16x128xbf16>
    %c0_35 = arith.constant 0 : index
    %c0_36 = arith.constant 0 : index
    %c0_37 = arith.constant 0 : index
    %103 = vector.load %arg9[%c0_35, %c0_36, %c0_37] : memref<1x128x128xbf16, #tpu.memory_space<vmem>>, vector<1x128x128xbf16>
    %104 = vector.shape_cast %103 : vector<1x128x128xbf16> to vector<128x128xbf16>
    %cst_38 = arith.constant dense<0.000000e+00> : vector<16x128xf32>
    %105 = tpu.matmul %102, %104, %cst_38 {dimension_numbers = #tpu.dot_dimension_numbers<[1], [0], [0], [1], [0, 0, 1, 1], [], []>} : vector<16x128xbf16>, vector<128x128xbf16>, vector<16x128xf32> -> vector<16x128xf32>
    %c0_39 = arith.constant 0 : index
    %c0_40 = arith.constant 0 : index
    %c0_41 = arith.constant 0 : index
    %106 = vector.load %arg10[%c0_39, %c0_40, %c0_41] : memref<1x1x128xf32, #tpu.memory_space<vmem>>, vector<1x1x128xf32>
    %107 = vector.shape_cast %106 : vector<1x1x128xf32> to vector<1x128xf32>
    %108 = vector.broadcast %107 : vector<1x128xf32> to vector<16x128xf32>
    %109 = arith.addf %105, %108 : vector<16x128xf32>
    %cst_42 = arith.constant 5.000000e-01 : f32
    %110 = vector.broadcast %cst_42 : f32 to vector<16x128xf32>
    %111 = arith.mulf %110, %109 : vector<16x128xf32>
    %cst_43 = arith.constant 4.471500e-02 : f32
    %112 = vector.broadcast %cst_43 : f32 to vector<16x128xf32>
    %113 = arith.mulf %112, %109 : vector<16x128xf32>
    %114 = arith.mulf %113, %109 : vector<16x128xf32>
    %115 = arith.mulf %114, %109 : vector<16x128xf32>
    %116 = arith.addf %109, %115 : vector<16x128xf32>
    %cst_44 = arith.constant 0.797884583 : f32
    %117 = vector.broadcast %cst_44 : f32 to vector<16x128xf32>
    %118 = arith.mulf %117, %116 : vector<16x128xf32>
    %119 = math.tanh %118 : vector<16x128xf32>
    %cst_45 = arith.constant 1.000000e+00 : f32
    %120 = vector.broadcast %cst_45 : f32 to vector<16x128xf32>
    %121 = arith.addf %120, %119 : vector<16x128xf32>
    %122 = arith.mulf %111, %121 : vector<16x128xf32>
    %123 = arith.truncf %122 : vector<16x128xf32> to vector<16x128xbf16>
    %c0_46 = arith.constant 0 : index
    %c0_47 = arith.constant 0 : index
    %c0_48 = arith.constant 0 : index
    %124 = vector.load %arg11[%c0_46, %c0_47, %c0_48] : memref<1x128x128xbf16, #tpu.memory_space<vmem>>, vector<1x128x128xbf16>
    %125 = vector.shape_cast %124 : vector<1x128x128xbf16> to vector<128x128xbf16>
    %cst_49 = arith.constant dense<0.000000e+00> : vector<16x128xf32>
    %126 = tpu.matmul %123, %125, %cst_49 {dimension_numbers = #tpu.dot_dimension_numbers<[1], [0], [0], [1], [0, 0, 1, 1], [], []>} : vector<16x128xbf16>, vector<128x128xbf16>, vector<16x128xf32> -> vector<16x128xf32>
    %c0_50 = arith.constant 0 : index
    %c0_51 = arith.constant 0 : index
    %c0_52 = arith.constant 0 : index
    %127 = vector.load %arg12[%c0_50, %c0_51, %c0_52] : memref<1x1x128xf32, #tpu.memory_space<vmem>>, vector<1x1x128xf32>
    %128 = vector.shape_cast %127 : vector<1x1x128xf32> to vector<1x128xf32>
    %129 = vector.broadcast %128 : vector<1x128xf32> to vector<16x128xf32>
    %130 = arith.addf %126, %129 : vector<16x128xf32>
    %131 = vector.shape_cast %130 : vector<16x128xf32> to vector<2x8x128xf32>
    %132 = arith.addf %100, %131 : vector<2x8x128xf32>
    %c0_53 = arith.constant 0 : index
    %c0_54 = arith.constant 0 : index
    %c0_55 = arith.constant 0 : index
    %133 = vector.load %arg13[%c0_53, %c0_54, %c0_55] : memref<1x1x128xf32, #tpu.memory_space<vmem>>, vector<1x1x128xf32>
    %134 = vector.shape_cast %133 : vector<1x1x128xf32> to vector<1x128xf32>
    %c0_56 = arith.constant 0 : index
    %c0_57 = arith.constant 0 : index
    %c0_58 = arith.constant 0 : index
    %135 = vector.load %arg14[%c0_56, %c0_57, %c0_58] : memref<1x1x128xf32, #tpu.memory_space<vmem>>, vector<1x1x128xf32>
    %136 = vector.shape_cast %135 : vector<1x1x128xf32> to vector<1x128xf32>
    %cst_59 = arith.constant dense<0.000000e+00> : vector<2x8xf32>
    %137 = vector.multi_reduction <add>, %132, %cst_59 [2] : vector<2x8x128xf32> to vector<2x8xf32>
    %138 = vector.shape_cast %137 : vector<2x8xf32> to vector<2x8x1xf32>
    %cst_60 = arith.constant 3.125000e-02 : f32
    %139 = vector.broadcast %cst_60 : f32 to vector<2x8x1xf32>
    %140 = arith.mulf %138, %139 : vector<2x8x1xf32>
    %141 = vector.broadcast %140 : vector<2x8x1xf32> to vector<2x8x128xf32>
    %142 = arith.subf %132, %141 : vector<2x8x128xf32>
    %143 = vector.broadcast %4 : vector<1x1x128xf32> to vector<2x8x128xf32>
    %144 = arith.mulf %142, %143 : vector<2x8x128xf32>
    %145 = arith.mulf %144, %144 : vector<2x8x128xf32>
    %cst_61 = arith.constant dense<0.000000e+00> : vector<2x8xf32>
    %146 = vector.multi_reduction <add>, %145, %cst_61 [2] : vector<2x8x128xf32> to vector<2x8xf32>
    %147 = vector.shape_cast %146 : vector<2x8xf32> to vector<2x8x1xf32>
    %cst_62 = arith.constant 3.125000e-02 : f32
    %148 = vector.broadcast %cst_62 : f32 to vector<2x8x1xf32>
    %149 = arith.mulf %147, %148 : vector<2x8x1xf32>
    %cst_63 = arith.constant 9.99999996E-13 : f32
    %150 = vector.broadcast %cst_63 : f32 to vector<2x8x1xf32>
    %151 = arith.addf %149, %150 : vector<2x8x1xf32>
    %152 = math.rsqrt %151 : vector<2x8x1xf32>
    %153 = vector.broadcast %152 : vector<2x8x1xf32> to vector<2x8x128xf32>
    %154 = arith.mulf %144, %153 : vector<2x8x128xf32>
    %155 = vector.shape_cast %134 : vector<1x128xf32> to vector<1x1x128xf32>
    %156 = vector.broadcast %155 : vector<1x1x128xf32> to vector<2x8x128xf32>
    %157 = arith.mulf %154, %156 : vector<2x8x128xf32>
    %158 = vector.shape_cast %136 : vector<1x128xf32> to vector<1x1x128xf32>
    %159 = vector.broadcast %158 : vector<1x1x128xf32> to vector<2x8x128xf32>
    %160 = arith.addf %157, %159 : vector<2x8x128xf32>
    %c0_64 = arith.constant 0 : index
    %c0_65 = arith.constant 0 : index
    %c0_66 = arith.constant 0 : index
    %161 = vector.load %arg21[%c0_64, %c0_65, %c0_66] : memref<2x8x128xf32, #tpu.memory_space<vmem>>, vector<2x8x128xf32>
    tpu.vector_store %arg21[%c0_64, %c0_65, %c0_66], %160 {strides = array<i32>} : memref<2x8x128xf32, #tpu.memory_space<vmem>>, vector<2x8x128xf32>,
    %c1_i32 = arith.constant 1 : i32
    %162 = arith.cmpi eq, %arg0, %c1_i32 : i32
    %163 = arith.extui %162 : i1 to i32
    %c0_i32_67 = arith.constant 0 : i32
    %164 = arith.cmpi ne, %163, %c0_i32_67 : i32
    scf.if %164 {
      %165 = vector.extract_strided_slice %160 {offsets = [0, 0, 0], sizes = [2, 1, 128], strides = [1, 1, 1]} : vector<2x8x128xf32> to vector<2x1x128xf32>
      %166 = vector.shape_cast %165 : vector<2x1x128xf32> to vector<2x128xf32>
      %167 = arith.truncf %166 : vector<2x128xf32> to vector<2x128xbf16>
      %c0_68 = arith.constant 0 : index
      %c0_69 = arith.constant 0 : index
      %168 = vector.load %arg17[%c0_68, %c0_69] : memref<128x128xbf16, #tpu.memory_space<vmem>>, vector<128x128xbf16>
      %cst_70 = arith.constant dense<0.000000e+00> : vector<2x128xf32>
      %169 = tpu.matmul %167, %168, %cst_70 {dimension_numbers = #tpu.dot_dimension_numbers<[1], [0], [0], [1], [0, 0, 1, 1], [], []>} : vector<2x128xbf16>, vector<128x128xbf16>, vector<2x128xf32> -> vector<2x128xf32>
      %c0_71 = arith.constant 0 : index
      %c0_72 = arith.constant 0 : index
      %170 = vector.load %arg18[%c0_71, %c0_72] : memref<1x128xf32, #tpu.memory_space<vmem>>, vector<1x128xf32>
      %171 = vector.broadcast %170 : vector<1x128xf32> to vector<2x128xf32>
      %172 = arith.addf %169, %171 : vector<2x128xf32>
      %173 = math.tanh %172 : vector<2x128xf32>
      %174 = arith.truncf %173 : vector<2x128xf32> to vector<2x128xbf16>
      %c0_73 = arith.constant 0 : index
      %c0_74 = arith.constant 0 : index
      %175 = vector.load %arg19[%c0_73, %c0_74] : memref<128x128xbf16, #tpu.memory_space<vmem>>, vector<128x128xbf16>
      %cst_75 = arith.constant dense<0.000000e+00> : vector<2x128xf32>
      %176 = tpu.matmul %174, %175, %cst_75 {dimension_numbers = #tpu.dot_dimension_numbers<[1], [0], [0], [1], [0, 0, 1, 1], [], []>} : vector<2x128xbf16>, vector<128x128xbf16>, vector<2x128xf32> -> vector<2x128xf32>
      %c0_76 = arith.constant 0 : index
      %c0_77 = arith.constant 0 : index
      %177 = vector.load %arg20[%c0_76, %c0_77] : memref<1x128xf32, #tpu.memory_space<vmem>>, vector<1x128xf32>
      %178 = vector.broadcast %177 : vector<1x128xf32> to vector<2x128xf32>
      %179 = arith.addf %176, %178 : vector<2x128xf32>
      %c0_78 = arith.constant 0 : index
      %c0_79 = arith.constant 0 : index
      %180 = vector.load %arg22[%c0_78, %c0_79] : memref<2x128xf32, #tpu.memory_space<vmem>>, vector<2x128xf32>
      tpu.vector_store %arg22[%c0_78, %c0_79], %179 {strides = array<i32>} : memref<2x128xf32, #tpu.memory_space<vmem>>, vector<2x128xf32>,
    } else {
    }
    return
  }
  func.func @transform_0(%arg0: i32) -> (i32, i32, i32) {
    %c0_i32 = arith.constant 0 : i32
    %c0_i32_0 = arith.constant 0 : i32
    %c0_i32_1 = arith.constant 0 : i32
    %c0_i32_2 = arith.constant 0 : i32
    return %c0_i32, %c0_i32_0, %c0_i32_1 : i32, i32, i32
  }
  func.func @transform_1(%arg0: i32) -> (i32, i32, i32) {
    %c0_i32 = arith.constant 0 : i32
    %c0_i32_0 = arith.constant 0 : i32
    %c0_i32_1 = arith.constant 0 : i32
    %c0_i32_2 = arith.constant 0 : i32
    return %c0_i32, %c0_i32_0, %c0_i32_1 : i32, i32, i32
  }
  func.func @transform_2(%arg0: i32) -> (i32, i32, i32) {
    %c0_i32 = arith.constant 0 : i32
    %c0_i32_0 = arith.constant 0 : i32
    %c0_i32_1 = arith.constant 0 : i32
    return %arg0, %c0_i32, %c0_i32_0 : i32, i32, i32
  }
  func.func @transform_3(%arg0: i32) -> (i32, i32, i32) {
    %c0_i32 = arith.constant 0 : i32
    %c0_i32_0 = arith.constant 0 : i32
    %c0_i32_1 = arith.constant 0 : i32
    return %arg0, %c0_i32, %c0_i32_0 : i32, i32, i32
  }
  func.func @transform_4(%arg0: i32) -> (i32, i32, i32) {
    %c0_i32 = arith.constant 0 : i32
    %c0_i32_0 = arith.constant 0 : i32
    %c0_i32_1 = arith.constant 0 : i32
    return %arg0, %c0_i32, %c0_i32_0 : i32, i32, i32
  }
  func.func @transform_5(%arg0: i32) -> (i32, i32, i32) {
    %c0_i32 = arith.constant 0 : i32
    %c0_i32_0 = arith.constant 0 : i32
    %c0_i32_1 = arith.constant 0 : i32
    return %arg0, %c0_i32, %c0_i32_0 : i32, i32, i32
  }
  func.func @transform_6(%arg0: i32) -> (i32, i32, i32) {
    %c0_i32 = arith.constant 0 : i32
    %c0_i32_0 = arith.constant 0 : i32
    %c0_i32_1 = arith.constant 0 : i32
    return %arg0, %c0_i32, %c0_i32_0 : i32, i32, i32
  }
  func.func @transform_7(%arg0: i32) -> (i32, i32, i32) {
    %c0_i32 = arith.constant 0 : i32
    %c0_i32_0 = arith.constant 0 : i32
    %c0_i32_1 = arith.constant 0 : i32
    return %arg0, %c0_i32, %c0_i32_0 : i32, i32, i32
  }
  func.func @transform_8(%arg0: i32) -> (i32, i32, i32) {
    %c0_i32 = arith.constant 0 : i32
    %c0_i32_0 = arith.constant 0 : i32
    %c0_i32_1 = arith.constant 0 : i32
    return %arg0, %c0_i32, %c0_i32_0 : i32, i32, i32
  }
  func.func @transform_9(%arg0: i32) -> (i32, i32, i32) {
    %c0_i32 = arith.constant 0 : i32
    %c0_i32_0 = arith.constant 0 : i32
    %c0_i32_1 = arith.constant 0 : i32
    return %arg0, %c0_i32, %c0_i32_0 : i32, i32, i32
  }
  func.func @transform_10(%arg0: i32) -> (i32, i32, i32) {
    %c0_i32 = arith.constant 0 : i32
    %c0_i32_0 = arith.constant 0 : i32
    %c0_i32_1 = arith.constant 0 : i32
    return %arg0, %c0_i32, %c0_i32_0 : i32, i32, i32
  }
  func.func @transform_11(%arg0: i32) -> (i32, i32, i32) {
    %c0_i32 = arith.constant 0 : i32
    %c0_i32_0 = arith.constant 0 : i32
    %c0_i32_1 = arith.constant 0 : i32
    return %arg0, %c0_i32, %c0_i32_0 : i32, i32, i32
  }
  func.func @transform_12(%arg0: i32) -> (i32, i32, i32) {
    %c0_i32 = arith.constant 0 : i32
    %c0_i32_0 = arith.constant 0 : i32
    %c0_i32_1 = arith.constant 0 : i32
    return %arg0, %c0_i32, %c0_i32_0 : i32, i32, i32
  }
  func.func @transform_13(%arg0: i32) -> (i32, i32, i32) {
    %c0_i32 = arith.constant 0 : i32
    %c0_i32_0 = arith.constant 0 : i32
    %c0_i32_1 = arith.constant 0 : i32
    return %arg0, %c0_i32, %c0_i32_0 : i32, i32, i32
  }
  func.func @transform_14(%arg0: i32) -> (i32, i32) {
    %c0_i32 = arith.constant 0 : i32
    %c0_i32_0 = arith.constant 0 : i32
    %c0_i32_1 = arith.constant 0 : i32
    return %c0_i32, %c0_i32_0 : i32, i32
  }
  func.func @transform_15(%arg0: i32) -> (i32, i32) {
    %c0_i32 = arith.constant 0 : i32
    %c0_i32_0 = arith.constant 0 : i32
    %c0_i32_1 = arith.constant 0 : i32
    return %c0_i32, %c0_i32_0 : i32, i32
  }
  func.func @transform_16(%arg0: i32) -> (i32, i32) {
    %c0_i32 = arith.constant 0 : i32
    %c0_i32_0 = arith.constant 0 : i32
    %c0_i32_1 = arith.constant 0 : i32
    return %c0_i32, %c0_i32_0 : i32, i32
  }
  func.func @transform_17(%arg0: i32) -> (i32, i32) {
    %c0_i32 = arith.constant 0 : i32
    %c0_i32_0 = arith.constant 0 : i32
    %c0_i32_1 = arith.constant 0 : i32
    return %c0_i32, %c0_i32_0 : i32, i32
  }
  func.func @transform_18(%arg0: i32) -> (i32, i32) {
    %c0_i32 = arith.constant 0 : i32
    %c0_i32_0 = arith.constant 0 : i32
    %c0_i32_1 = arith.constant 0 : i32
    return %c0_i32, %c0_i32_0 : i32, i32
  }
  func.func @transform_19(%arg0: i32) -> (i32, i32) {
    %c0_i32 = arith.constant 0 : i32
    %c0_i32_0 = arith.constant 0 : i32
    %c0_i32_1 = arith.constant 0 : i32
    return %c0_i32, %c0_i32_0 : i32, i32
  }
  func.func @transform_20(%arg0: i32) -> (i32, i32, i32) {
    %c0_i32 = arith.constant 0 : i32
    %c0_i32_0 = arith.constant 0 : i32
    %c0_i32_1 = arith.constant 0 : i32
    %c0_i32_2 = arith.constant 0 : i32
    return %c0_i32, %c0_i32_0, %c0_i32_1 : i32, i32, i32
  }
  func.func @transform_21(%arg0: i32) -> (i32, i32) {
    %c0_i32 = arith.constant 0 : i32
    %c0_i32_0 = arith.constant 0 : i32
    %c0_i32_1 = arith.constant 0 : i32
    return %c0_i32, %c0_i32_0 : i32, i32
  }
}

</mosaic_0001>

<bundles_post_ra>
// kernel: bert_forward.1
= control target key start
LH: loop header
LB: loop body
LE: loop exit
PB: predicated region body
PF: predicated region fallthrough
CT: control target
= control target key end

     0   :  { %s5686_s0 = inlined_call_operand.hbm [shape: f32[2,8,128], index: 0, kind: input, shape index: {}]   ;;  %s5687_s1 = inlined_call_operand.hbm [shape: f32[4,1,8], index: 1, kind: input, shape index: {}]   ;;  %s5688_s2 = inlined_call_operand.hbm [shape: bf16[2,128,768], index: 2, kind: input, shape index: {}]   ;;  %s5689_s3 = inlined_call_operand.hbm [shape: f32[2,1,768], index: 3, kind: input, shape index: {}]   ;;  %s5690_s4 = inlined_call_operand.hbm [shape: bf16[2,256,128], index: 4, kind: input, shape index: {}]   ;;  %s5691_s5 = inlined_call_operand.hbm [shape: f32[2,1,128], index: 5, kind: input, shape index: {}]   ;;  %s5692_s6 = inlined_call_operand.hbm [shape: f32[2,1,128], index: 6, kind: input, shape index: {}]   ;;  %s5693_s7 = inlined_call_operand.hbm [shape: f32[2,1,128], index: 7, kind: input, shape index: {}]   ;;  %s5694_s8 = inlined_call_operand.hbm [shape: bf16[2,128,128], index: 8, kind: input, shape index: {}]   ;;  %s5695_s9 = inlined_call_operand.hbm [shape: f32[2,1,128], index: 9, kind: input, shape index: {}]   ;;  %s5696_s10 = inlined_call_operand.hbm [shape: bf16[2,128,128], index: 10, kind: input, shape index: {}]   ;;  %s5697_s11 = inlined_call_operand.hbm [shape: f32[2,1,128], index: 11, kind: input, shape index: {}]   ;;  %s5698_s12 = inlined_call_operand.hbm [shape: f32[2,1,128], index: 12, kind: input, shape index: {}]   ;;  %s5699_s13 = inlined_call_operand.hbm [shape: f32[2,1,128], index: 13, kind: input, shape index: {}]   ;;  %s5700_s14 = inlined_call_operand.hbm [shape: f32[1,128], index: 14, kind: input, shape index: {}]   ;;  %s5701_s15 = inlined_call_operand.hbm [shape: f32[1,128], index: 15, kind: input, shape index: {}]   ;;  %s5702_s16 = inlined_call_operand.hbm [shape: bf16[128,128], index: 16, kind: input, shape index: {}]   ;;  %s5703_s17 = inlined_call_operand.hbm [shape: f32[1,128], index: 17, kind: input, shape index: {}]   ;;  %s5704_s18 = inlined_call_operand.hbm [shape: bf16[128,128], index: 18, kind: input, shape index: {}]   ;;  %s5705_s19 = inlined_call_operand.hbm [shape: f32[1,128], index: 19, kind: input, shape index: {}]   ;;  %s5706_s20 = inlined_call_operand.hbm [shape: f32[2,8,128], index: 20, kind: output, shape index: {0}]   ;;  %s5707_s21 = inlined_call_operand.hbm [shape: f32[2,128], index: 21, kind: output, shape index: {1}]  }
   0x1   :  { %5754 = sst [smem:[#allocation47_spill]] %s5686_s0 }
   0x2   :  { %5755 = sst [smem:[#allocation48_spill]] %s5687_s1 }
   0x3   :  { %5756 = sst [smem:[#allocation49_spill]] %s5688_s2 }
   0x4   :  { %5757 = sst [smem:[#allocation50_spill]] %s5689_s3 }
   0x5   :  { %5758 = sst [smem:[#allocation51_spill]] %s5690_s4 }
   0x6   :  { %5759 = sst [smem:[#allocation52_spill]] %s5691_s5 }
   0x7   :  { %5760 = sst [smem:[#allocation53_spill]] %s5692_s6 }
   0x8   :  { %5761 = sst [smem:[#allocation54_spill]] %s5693_s7 }
   0x9   :  { %5762 = sst [smem:[#allocation55_spill]] %s5694_s8 }
   0xa   :  { %5763 = sst [smem:[#allocation56_spill]] %s5695_s9 }
   0xb   :  { %5764 = sst [smem:[#allocation57_spill]] %s5696_s10 }
   0xc   :  { %5765 = sst [smem:[#allocation58_spill]] %s5697_s11 }
   0xd   :  { %5766 = sst [smem:[#allocation59_spill]] %s5698_s12 }
   0xe   :  { %5767 = sst [smem:[#allocation60_spill]] %s5699_s13 }
   0xf   :  { %5768 = sst [smem:[#allocation61_spill]] %s5700_s14 }
  0x10   :  { %5769 = sst [smem:[#allocation62_spill]] %s5701_s15 }
  0x11   :  { %5770 = sst [smem:[#allocation63_spill]] %s5702_s16 }
  0x12   :  { %5771 = sst [smem:[#allocation64_spill]] %s5704_s18 }
  0x13   :  { %5772 = sst [smem:[#allocation65_spill]] %s5705_s19 }
  0x14   :  { %5773 = sst [smem:[#allocation66_spill]] %s5706_s20 }
  0x15   :  { %5774 = sst [smem:[#allocation67_spill]] %s5707_s21 }
  0x16   :  { %27 = vsyncpa [#allocation3], 0 }
  0x17   :  { %28 = vsyncpa [#allocation6], 0 }
  0x18   :  { %29 = vsyncpa [#allocation21], 0 }
  0x19   :  { %30 = vsyncpa [#allocation24], 0 }
  0x1a   :  { %31 = vsyncpa [#allocation27], 0 }
  0x1b   :  { %32 = vsyncpa [#allocation4], 0 }
  0x1c   :  { %33 = vsyncpa [#allocation30], 0  ;;  %s4777_s2 = smov 0   ;;  %s4779_s25 = smov 0  }
  0x1d   :  { %s4781_s26 = smov 0   ;;  %s4783_s27 = smov 0  }
  0x1e LB: > { %5775 = sst [smem:[#allocation40_spill]] %s4619_s25  ;;  %s4796_s3 = sadd.s32 4294967295, %s4627_s27   ;;  %s4627_s27 = sphi %s4783_s27, %s5851_s27   ;;  %s4623_s26 = sphi %s4781_s26, %s5854_s26   ;;  %s4619_s25 = sphi %s4779_s25, %s5853_s25   ;;  %s4615_s2 = sphi %s4777_s2, %s5852_s2  }
  0x1f   : > { %5776 = sst [smem:[#allocation41_spill]] %s4623_s26  ;;  %p101_p0 = scmp.ne.s32.totalorder %s4619_s25, %s4615_s2 }
  0x20   : > { %5777 = sst [smem:[#allocation42_spill]] %s4796_s3  ;;  %p5723_p1 = scmp.eq.s32.totalorder %s4796_s3, 0 }
  0x21   : > { %p3191_p2 = scmp.ge.s32.totalorder %s4627_s27, 1  ;;  %p566_p3 = scmp.lt.s32.totalorder %s4627_s27, 3 }
  0x22   : > { %p4805_p5 = por %p5723_p1, %p101_p0  ;;  %s4629_s0 = smov [#allocation2]  }
  0x23   : > { %p4809_p6 = pnand %p3191_p2, %p566_p3  ;;  %s578_s4 = sshll.u32 %s4629_s0, 4  ;;  %s579_s4 = int_to_ptr.vmem [resolvable:$true] %s578_s4 }
  0x24   : > { %s5778_s28 = scalar_select %p4805_p5, 1, 0 }
  0x25   : > { %s5780_s29 = scalar_select %p4809_p6, 1, 0 }
  0x26   : > { %5779 = sst [smem:[#allocation43_spill]] %s5778_s28  ;;  %p3630_p7 = pneg %p4809_p6 }
  0x27   : > { %5781 = sst [smem:[#allocation44_spill]] %s5780_s29  ;;  %s4822_s5 = sadd.s32 1, %s4627_s27  }
  0x28   : > { %p4817_p8 = pnand %p3630_p7, %p5723_p1  ;;  %5783 = sst [smem:[#allocation45_spill]] %s4822_s5 }
  0x29   : > { %s88_s22 = sadd.s32 1, %s4623_s26  ;;  %s85_s23 = ssub.s32 %s4627_s27, %s4822_s5 }
  0x2a   : > { %s5782_s30 = scalar_select %p4817_p8, 1, 0 }
  0x2b   : > { %s5784_s2 = sld [smem:[#allocation47_spill]]  ;;  %p4835_p10 = pneg %p4817_p8 }
  0x2d   : > { %s5786_s3 = scalar_select %p4835_p10, 1, 0 }
  0x31   : > { %s5785_s21 = smov %s5784_s2  ;;  %s3925_s20 = scalar_lea.hbm %s5784_s2, 256 }
  0x32   : > { %p3926_p9 = scmp.ne.s32.totalorder %s5785_s21, %s3925_s20  ;;  %p3932_p13 = scmp.lt.u32.totalorder %s3925_s20, %s5785_s21 }
  0x34   : > { %p3928_p11 = pnand %p4835_p10, %p3926_p9 }
  0x36   : > { %p3929_p12 = pneg %p3928_p11 }
  0x38   : > { %p3934_p0 = pnand %p3932_p13, %p3929_p12 }
  0x3a   : > { %3937 = shalt.err (!%p3934_p0)
}
  0x3b   : > { %s3938_s1 = scalar_lea.vmem %s579_s4, 256  ;;  %p3946_p4 = scmp.lt.s32.totalorder %s579_s4, %s579_s4 }
  0x3c   : > { %p3939_p2 = scmp.ne.s32.totalorder %s579_s4, %s3938_s1  ;;  %p3947_p1 = scmp.lt.s32.totalorder %s3938_s1, %s3938_s1 }
  0x3e   : > { %p3941_p3 = pnand %p3939_p2, %p4835_p10  ;;  %p3948_p5 = por %p3947_p1, %p3946_p4 }
  0x40   : > { %p3942_p7 = pneg %p3941_p3 }
  0x42   : > { %p3949_p6 = pnand %p3948_p5, %p3942_p7 }
  0x44   : > { %3952 = shalt.err (!%p3949_p6)
}
  0x45   : > { %s4630_s28 = smov 128   ;;  %s4631_s19 = smov 8  }
  0x46   : > { %3633 = dma.hbm_to_vmem [thread:$0]  (!%p4817_p8), %s5785_s21, 256, %s579_s4, [#allocation3], %s4630_s28, %s4630_s28, %s4631_s19  }
  0x47   : > { %p86_p9 = scmp.eq.s32.totalorder %s85_s23, 0  ;;  %p95_p1 = scmp.ne.s32.totalorder %s4623_s26, %s4619_s25 }
  0x48   : > { %p96_p4 = scmp.eq.s32.totalorder %s4627_s27, 0  ;;  %p3700_p5 = scmp.lt.s32.totalorder %s4627_s27, 2 }
  0x49   : > { %s4856_s24 = scalar_select %p86_p9, %s4623_s26, %s88_s22  }
  0x4a   : > { %p97_p6 = por %p96_p4, %p95_p1  ;;  %s675_s2 = sand.u32 1, %s4627_s27  }
  0x4b   : > { %5787 = sst [smem:[#allocation46_spill]] %s4856_s24  ;;  %s4860_s0 = sand.u32 1, %s4623_s26  }
  0x4c   : > { %s3560_s1 = smul.u32 384, %s4860_s0  ;;  %p4863_p11 = pnand %p3700_p5, %p97_p6 }
  0x4d   : > { %s3561_s13 = smul.u32 6144, %s4627_s27  ;;  %s5789_s23 = sld [smem:[#allocation49_spill]] }
  0x4e   : > { %s5788_s5 = scalar_select %p4863_p11, 1, 0 }
  0x4f   : > { %s679_s22 = scalar_lea.vmem [#allocation7], %s3560_s1  ;;  %s4875_s29 = scalar_lea.sflag [#allocation3], %s675_s2 }
  0x50   : > { %s686_s19 = sshll.u32 %s679_s22, 4  ;;  %p4881_p13 = pneg %p4863_p11  ;;  %s4873_s19 = int_to_ptr.vmem [resolvable:$true] %s686_s19 }
  0x52   : > { %s5790_s24 = scalar_select %p4881_p13, 1, 0 }
  0x53   : > { %s4871_s28 = scalar_lea.hbm %s5789_s23, %s3561_s13  ;;  %s3958_s1 = scalar_lea.hbm %s5789_s23, 12288 }
  0x54   : > { %s3953_s21 = scalar_lea.hbm %s4871_s28, 6144  ;;  %p3959_p3 = scmp.lt.u32.totalorder %s4871_s28, %s5789_s23 }
  0x55   : > { %p3954_p12 = scmp.ne.s32.totalorder %s4871_s28, %s3953_s21  ;;  %p3960_p7 = scmp.lt.u32.totalorder %s3958_s1, %s3953_s21 }
  0x56   : > { %p3962_p1 = scmp.lt.u32.totalorder %s3953_s21, %s4871_s28 }
  0x57   : > { %p3956_p0 = pnand %p4881_p13, %p3954_p12  ;;  %p3961_p9 = por %p3960_p7, %p3959_p3 }
  0x59   : > { %p3957_p2 = pneg %p3956_p0  ;;  %p3963_p4 = por %p3962_p1, %p3961_p9 }
  0x5b   : > { %p3964_p5 = pnand %p3963_p4, %p3957_p2 }
  0x5d   : > { %3967 = shalt.err (!%p3964_p5)
}
  0x5e   : > { %s3968_s2 = scalar_lea.vmem %s4873_s19, 6144  ;;  %s4632_s13 = smov [#allocation7]  }
  0x5f   : > { %p3969_p6 = scmp.ne.s32.totalorder %s4873_s19, %s3968_s2  ;;  %s3973_s20 = sshll.u32 %s4632_s13, 4  ;;  %s3974_s20 = int_to_ptr.vmem [resolvable:$false] %s3973_s20 }
  0x60   : > { %s3975_s4 = scalar_lea.vmem %s3974_s20, 12288  ;;  %p3976_p8 = scmp.lt.s32.totalorder %s4873_s19, %s3974_s20 }
  0x61   : > { %p3971_p12 = pnand %p3969_p6, %p4881_p13  ;;  %p3977_p10 = scmp.lt.s32.totalorder %s3975_s4, %s3968_s2 }
  0x63   : > { %p3972_p0 = pneg %p3971_p12  ;;  %p3978_p3 = por %p3977_p10, %p3976_p8 }
  0x65   : > { %p3979_p7 = pnand %p3978_p3, %p3972_p0 }
  0x67   : > { %3982 = shalt.err (!%p3979_p7)
}
  0x68   : > { %s4633_s21 = smov 384   ;;  %s4634_s1 = smov 24  }
  0x69   : > { %3658 = dma.hbm_to_vmem [thread:$0]  (!%p4863_p11), %s4871_s28, 6144, %s4873_s19, %s4875_s29, %s4633_s21, %s4633_s21, %s4634_s1  }
  0x6a   : > { %s3562_s22 = smul.u32 6, %s4860_s0  ;;  %s3203_s23 = sshll.u32 %s4860_s0, 7 }
  0x6b   : > { %s3563_s13 = smul.u32 96, %s4627_s27  ;;  %s5791_s4 = sld [smem:[#allocation50_spill]] }
  0x6c   : > { %s700_s25 = scalar_lea.vmem [#allocation8], %s3562_s22 }
  0x6d   : > { %s708_s18 = sshll.u32 %s700_s25, 4  ;;  %s709_s18 = int_to_ptr.vmem [resolvable:$true] %s708_s18 }
  0x71   : > { %s4911_s26 = scalar_lea.hbm %s5791_s4, %s3563_s13  ;;  %s3988_s21 = scalar_lea.hbm %s5791_s4, 192 }
  0x72   : > { %s3983_s16 = scalar_lea.hbm %s4911_s26, 96  ;;  %p3989_p9 = scmp.lt.u32.totalorder %s4911_s26, %s5791_s4 }
  0x73   : > { %p3984_p8 = scmp.ne.s32.totalorder %s4911_s26, %s3983_s16  ;;  %p3990_p1 = scmp.lt.u32.totalorder %s3988_s21, %s3983_s16 }
  0x74   : > { %p3992_p5 = scmp.lt.u32.totalorder %s3983_s16, %s4911_s26 }
  0x75   : > { %p3986_p10 = pnand %p3984_p8, %p4881_p13  ;;  %p3991_p4 = por %p3990_p1, %p3989_p9 }
  0x77   : > { %p3987_p2 = pneg %p3986_p10  ;;  %p3993_p6 = por %p3992_p5, %p3991_p4 }
  0x79   : > { %p3994_p12 = pnand %p3993_p6, %p3987_p2 }
  0x7b   : > { %3997 = shalt.err (!%p3994_p12)
}
  0x7c   : > { %s3998_s25 = scalar_lea.vmem %s709_s18, 96  ;;  %s4635_s22 = smov [#allocation8]  }
  0x7d   : > { %p3999_p0 = scmp.ne.s32.totalorder %s709_s18, %s3998_s25  ;;  %s4003_s13 = sshll.u32 %s4635_s22, 4  ;;  %s4004_s13 = int_to_ptr.vmem [resolvable:$false] %s4003_s13 }
  0x7e   : > { %s4005_s2 = scalar_lea.vmem %s4004_s13, 192  ;;  %p4006_p8 = scmp.lt.s32.totalorder %s709_s18, %s4004_s13 }
  0x7f   : > { %p4001_p3 = pnand %p3999_p0, %p4881_p13  ;;  %p4007_p10 = scmp.lt.s32.totalorder %s4005_s2, %s3998_s25 }
  0x81   : > { %p4002_p7 = pneg %p4001_p3  ;;  %p4008_p11 = por %p4007_p10, %p4006_p8 }
  0x83   : > { %p4009_p1 = pnand %p4008_p11, %p4002_p7 }
  0x85   : > { %4012 = shalt.err (!%p4009_p1)
}
  0x86   : > { %p5792_p9 = scmp.ne.s32.totalorder %s5788_s5, 0  ;;  %s3355_s16 = sshll.u32 %s4627_s27, 11 }
  0x87   : > { %s719_s28 = scalar_lea.vmem [#allocation9], %s3203_s23  ;;  %s5793_s20 = sld [smem:[#allocation51_spill]] }
  0x88   : > { %3661 = dma.hbm_to_vmem [thread:$0]  (!%p5792_p9), %s4911_s26, 96, %s709_s18, %s4875_s29  }
  0x89   : > { %s726_s19 = sshll.u32 %s719_s28, 4  ;;  %s4939_s19 = int_to_ptr.vmem [resolvable:$true] %s726_s19 }
  0x8d   : > { %s4937_s22 = scalar_lea.hbm %s5793_s20, %s3355_s16  ;;  %s4018_s23 = scalar_lea.hbm %s5793_s20, 4096 }
  0x8e   : > { %s4013_s25 = scalar_lea.hbm %s4937_s22, 2048  ;;  %p4019_p5 = scmp.lt.u32.totalorder %s4937_s22, %s5793_s20 }
  0x8f   : > { %p4014_p11 = scmp.ne.s32.totalorder %s4937_s22, %s4013_s25  ;;  %p4020_p6 = scmp.lt.u32.totalorder %s4018_s23, %s4013_s25 }
  0x90   : > { %p4022_p0 = scmp.lt.u32.totalorder %s4013_s25, %s4937_s22 }
  0x91   : > { %p4016_p2 = pnand %p4014_p11, %p4881_p13  ;;  %p4021_p12 = por %p4020_p6, %p4019_p5 }
  0x93   : > { %p4017_p4 = pneg %p4016_p2  ;;  %p4023_p3 = por %p4022_p0, %p4021_p12 }
  0x95   : > { %p4024_p7 = pnand %p4023_p3, %p4017_p4 }
  0x97   : > { %4027 = shalt.err (!%p4024_p7)
}
  0x98   : > { %s4028_s16 = scalar_lea.vmem %s4939_s19, 2048  ;;  %s4636_s28 = smov [#allocation9]  }
  0x99   : > { %p4029_p8 = scmp.ne.s32.totalorder %s4939_s19, %s4028_s16  ;;  %s4033_s21 = sshll.u32 %s4636_s28, 4  ;;  %s4034_s21 = int_to_ptr.vmem [resolvable:$false] %s4033_s21 }
  0x9a   : > { %s4035_s1 = scalar_lea.vmem %s4034_s21, 4096  ;;  %p4036_p11 = scmp.lt.s32.totalorder %s4939_s19, %s4034_s21 }
  0x9b   : > { %p4031_p10 = pnand %p4029_p8, %p4881_p13  ;;  %p4037_p2 = scmp.lt.s32.totalorder %s4035_s1, %s4028_s16 }
  0x9d   : > { %p4032_p1 = pneg %p4031_p10  ;;  %p4038_p5 = por %p4037_p2, %p4036_p11 }
  0x9f   : > { %p4039_p6 = pnand %p4038_p5, %p4032_p1 }
  0xa1   : > { %4042 = shalt.err (!%p4039_p6)
}
  0xa2   : > { %s5742_s25 = smov 64   ;;  %s5744_s18 = smov 4  }
  0xa3   : > { %3664 = dma.hbm_to_vmem [thread:$0]  (!%p5792_p9), %s4937_s22, 2048, %s4939_s19, %s4875_s29, %s5742_s25, %s5742_s25, %s5744_s18  }
  0xa4   : > { %s4967_s26 = sshll.u32 %s4627_s27, 4  ;;  %s5794_s2 = sld [smem:[#allocation52_spill]] }
  0xa5   : > { %s739_s21 = scalar_lea.vmem [#allocation10], %s4860_s0 }
  0xa6   : > { %s746_s1 = sshll.u32 %s739_s21, 4  ;;  %s747_s1 = int_to_ptr.vmem [resolvable:$true] %s746_s1 }
  0xaa   : > { %s5795_s16 = smov %s5794_s2  ;;  %s4973_s28 = scalar_lea.hbm %s5794_s2, %s4967_s26 }
  0xab   : > { %s4043_s4 = scalar_lea.hbm %s4973_s28, 16  ;;  %s4048_s25 = scalar_lea.hbm %s5795_s16, 32 }
  0xac   : > { %p4044_p4 = scmp.ne.s32.totalorder %s4973_s28, %s4043_s4  ;;  %p4049_p3 = scmp.lt.u32.totalorder %s4973_s28, %s5795_s16 }
  0xad   : > { %p4050_p7 = scmp.lt.u32.totalorder %s4048_s25, %s4043_s4  ;;  %p4052_p10 = scmp.lt.u32.totalorder %s4043_s4, %s4973_s28 }
  0xae   : > { %p4046_p12 = pnand %p4044_p4, %p4881_p13 }
  0xaf   : > { %p4051_p8 = por %p4050_p7, %p4049_p3 }
  0xb0   : > { %p4047_p0 = pneg %p4046_p12 }
  0xb1   : > { %p4053_p1 = por %p4052_p10, %p4051_p8 }
  0xb3   : > { %p4054_p11 = pnand %p4053_p1, %p4047_p0 }
  0xb5   : > { %4057 = shalt.err (!%p4054_p11)
}
  0xb6   : > { %s4058_s13 = scalar_lea.vmem %s747_s1, 16  ;;  %s4639_s2 = smov [#allocation10]  }
  0xb7   : > { %p4059_p2 = scmp.ne.s32.totalorder %s747_s1, %s4058_s13  ;;  %s4063_s21 = sshll.u32 %s4639_s2, 4  ;;  %s4064_s21 = int_to_ptr.vmem [resolvable:$false] %s4063_s21 }
  0xb8   : > { %s4065_s19 = scalar_lea.vmem %s4064_s21, 32  ;;  %p4066_p4 = scmp.lt.s32.totalorder %s747_s1, %s4064_s21 }
  0xb9   : > { %p4061_p5 = pnand %p4059_p2, %p4881_p13  ;;  %p4067_p12 = scmp.lt.s32.totalorder %s4065_s19, %s4058_s13 }
  0xbb   : > { %p4062_p6 = pneg %p4061_p5  ;;  %p4068_p9 = por %p4067_p12, %p4066_p4 }
  0xbd   : > { %p4069_p3 = pnand %p4068_p9, %p4062_p6 }
  0xbf   : > { %4072 = shalt.err (!%p4069_p3)
}
  0xc0   : > { %p5796_p7 = scmp.ne.s32.totalorder %s5788_s5, 0  ;;  %s5797_s6 = sld [smem:[#allocation53_spill]] }
  0xc1   : > { %s756_s22 = scalar_lea.vmem [#allocation11], %s4860_s0 }
  0xc2   : > { %3667 = dma.hbm_to_vmem [thread:$0]  (!%p5796_p7), %s4973_s28, 16, %s747_s1, %s4875_s29  }
  0xc3   : > { %s763_s23 = sshll.u32 %s756_s22, 4  ;;  %s764_s23 = int_to_ptr.vmem [resolvable:$true] %s763_s23 }
  0xc6   : > { %s4998_s18 = scalar_lea.hbm %s5797_s6, %s4967_s26  ;;  %s4078_s28 = scalar_lea.hbm %s5797_s6, 32 }
  0xc7   : > { %s4073_s13 = scalar_lea.hbm %s4998_s18, 16  ;;  %p4079_p10 = scmp.lt.u32.totalorder %s4998_s18, %s5797_s6 }
  0xc8   : > { %p4074_p9 = scmp.ne.s32.totalorder %s4998_s18, %s4073_s13  ;;  %p4080_p1 = scmp.lt.u32.totalorder %s4078_s28, %s4073_s13 }
  0xc9   : > { %p4082_p2 = scmp.lt.u32.totalorder %s4073_s13, %s4998_s18 }
  0xca   : > { %p4076_p0 = pnand %p4074_p9, %p4881_p13  ;;  %p4081_p11 = por %p4080_p1, %p4079_p10 }
  0xcc   : > { %p4077_p8 = pneg %p4076_p0  ;;  %p4083_p5 = por %p4082_p2, %p4081_p11 }
  0xce   : > { %p4084_p6 = pnand %p4083_p5, %p4077_p8 }
  0xd0   : > { %4087 = shalt.err (!%p4084_p6)
}
  0xd1   : > { %s4088_s4 = scalar_lea.vmem %s764_s23, 16  ;;  %s4640_s25 = smov [#allocation11]  }
  0xd2   : > { %p4089_p4 = scmp.ne.s32.totalorder %s764_s23, %s4088_s4  ;;  %s4093_s22 = sshll.u32 %s4640_s25, 4  ;;  %s4094_s22 = int_to_ptr.vmem [resolvable:$false] %s4093_s22 }
  0xd3   : > { %s4095_s2 = scalar_lea.vmem %s4094_s22, 32  ;;  %p4096_p9 = scmp.lt.s32.totalorder %s764_s23, %s4094_s22 }
  0xd4   : > { %p4091_p12 = pnand %p4089_p4, %p4881_p13  ;;  %p4097_p0 = scmp.lt.s32.totalorder %s4095_s2, %s4088_s4 }
  0xd6   : > { %p4092_p3 = pneg %p4091_p12  ;;  %p4098_p7 = por %p4097_p0, %p4096_p9 }
  0xd8   : > { %p4099_p1 = pnand %p4098_p7, %p4092_p3 }
  0xda   : > { %4102 = shalt.err (!%p4099_p1)
}
  0xdb   : > { %p5798_p10 = scmp.ne.s32.totalorder %s5788_s5, 0  ;;  %s5799_s7 = sld [smem:[#allocation54_spill]] }
  0xdc   : > { %s773_s1 = scalar_lea.vmem [#allocation12], %s4860_s0 }
  0xdd   : > { %3670 = dma.hbm_to_vmem [thread:$0]  (!%p5798_p10), %s4998_s18, 16, %s764_s23, %s4875_s29  }
  0xde   : > { %s780_s19 = sshll.u32 %s773_s1, 4  ;;  %s781_s19 = int_to_ptr.vmem [resolvable:$true] %s780_s19 }
  0xe1   : > { %s5023_s28 = scalar_lea.hbm %s5799_s7, %s4967_s26  ;;  %s4108_s23 = scalar_lea.hbm %s5799_s7, 32 }
  0xe2   : > { %s4103_s25 = scalar_lea.hbm %s5023_s28, 16  ;;  %p4109_p2 = scmp.lt.u32.totalorder %s5023_s28, %s5799_s7 }
  0xe3   : > { %p4104_p7 = scmp.ne.s32.totalorder %s5023_s28, %s4103_s25  ;;  %p4110_p5 = scmp.lt.u32.totalorder %s4108_s23, %s4103_s25 }
  0xe4   : > { %p4112_p4 = scmp.lt.u32.totalorder %s4103_s25, %s5023_s28 }
  0xe5   : > { %p4106_p8 = pnand %p4104_p7, %p4881_p13  ;;  %p4111_p6 = por %p4110_p5, %p4109_p2 }
  0xe7   : > { %p4107_p11 = pneg %p4106_p8  ;;  %p4113_p12 = por %p4112_p4, %p4111_p6 }
  0xe9   : > { %p4114_p3 = pnand %p4113_p12, %p4107_p11 }
  0xeb   : > { %4117 = shalt.err (!%p4114_p3)
}
  0xec   : > { %s4118_s21 = scalar_lea.vmem %s781_s19, 16  ;;  %s4641_s1 = smov [#allocation12]  }
  0xed   : > { %p4119_p9 = scmp.ne.s32.totalorder %s781_s19, %s4118_s21  ;;  %s4123_s4 = sshll.u32 %s4641_s1, 4  ;;  %s4124_s4 = int_to_ptr.vmem [resolvable:$false] %s4123_s4 }
  0xee   : > { %s4125_s22 = scalar_lea.vmem %s4124_s4, 32  ;;  %p4126_p7 = scmp.lt.s32.totalorder %s781_s19, %s4124_s4 }
  0xef   : > { %p4121_p0 = pnand %p4119_p9, %p4881_p13  ;;  %p4127_p8 = scmp.lt.s32.totalorder %s4125_s22, %s4118_s21 }
  0xf1   : > { %p4122_p1 = pneg %p4121_p0  ;;  %p4128_p10 = por %p4127_p8, %p4126_p7 }
  0xf3   : > { %p4129_p2 = pnand %p4128_p10, %p4122_p1 }
  0xf5   : > { %4132 = shalt.err (!%p4129_p2)
}
  0xf6   : > { %p5800_p5 = scmp.ne.s32.totalorder %s5788_s5, 0  ;;  %s5747_s25 = sshll.u32 %s4627_s27, 10 }
  0xf7   : > { %s5801_s8 = sld [smem:[#allocation55_spill]]  ;;  %s5802_s4 = sshll.u32 %s4860_s0, 6 }
  0xf8   : > { %3673 = dma.hbm_to_vmem [thread:$0]  (!%p5800_p5), %s5023_s28, 16, %s781_s19, %s4875_s29  }
  0xf9   : > { %s791_s13 = scalar_lea.vmem [#allocation13], %s5802_s4 }
  0xfa   : > { %s798_s21 = sshll.u32 %s791_s13, 4  ;;  %s5055_s21 = int_to_ptr.vmem [resolvable:$true] %s798_s21 }
  0xfd   : > { %s5051_s2 = scalar_lea.hbm %s5801_s8, %s5747_s25  ;;  %s4138_s22 = scalar_lea.hbm %s5801_s8, 2048 }
  0xfe   : > { %s4133_s1 = scalar_lea.hbm %s5051_s2, 1024  ;;  %p4139_p4 = scmp.lt.u32.totalorder %s5051_s2, %s5801_s8 }
  0xff   : > { %p4134_p10 = scmp.ne.s32.totalorder %s5051_s2, %s4133_s1  ;;  %p4140_p12 = scmp.lt.u32.totalorder %s4138_s22, %s4133_s1 }
 0x100   : > { %p4142_p9 = scmp.lt.u32.totalorder %s4133_s1, %s5051_s2 }
 0x101   : > { %p4136_p11 = pnand %p4134_p10, %p4881_p13  ;;  %p4141_p3 = por %p4140_p12, %p4139_p4 }
 0x103   : > { %p4137_p6 = pneg %p4136_p11  ;;  %p4143_p0 = por %p4142_p9, %p4141_p3 }
 0x105   : > { %p4144_p1 = pnand %p4143_p0, %p4137_p6 }
 0x107   : > { %4147 = shalt.err (!%p4144_p1)
}
 0x108   : > { %s4148_s4 = scalar_lea.vmem %s5055_s21, 1024  ;;  %s4642_s13 = smov [#allocation13]  }
 0x109   : > { %p4149_p7 = scmp.ne.s32.totalorder %s5055_s21, %s4148_s4  ;;  %s4153_s28 = sshll.u32 %s4642_s13, 4  ;;  %s4154_s28 = int_to_ptr.vmem [resolvable:$false] %s4153_s28 }
 0x10a   : > { %s4155_s19 = scalar_lea.vmem %s4154_s28, 2048  ;;  %p4156_p10 = scmp.lt.s32.totalorder %s5055_s21, %s4154_s28 }
 0x10b   : > { %p4151_p8 = pnand %p4149_p7, %p4881_p13  ;;  %p4157_p11 = scmp.lt.s32.totalorder %s4155_s19, %s4148_s4 }
 0x10d   : > { %p4152_p2 = pneg %p4151_p8  ;;  %p4158_p4 = por %p4157_p11, %p4156_p10 }
 0x10f   : > { %p4159_p12 = pnand %p4158_p4, %p4152_p2 }
 0x111   : > { %4162 = shalt.err (!%p4159_p12)
}
 0x112   : > { %s5803_s1 = smov 4   ;;  %s5804_s22 = smov 64  }
 0x113   : > { %3676 = dma.hbm_to_vmem [thread:$0]  (!%p5800_p5), %s5051_s2, 1024, %s5055_s21, %s4875_s29, %s5804_s22, %s5804_s22, %s5803_s1  }
 0x114   : > { %s5805_s9 = sld [smem:[#allocation56_spill]]  ;;  %s811_s4 = scalar_lea.vmem [#allocation14], %s4860_s0 }
 0x115   : > { %s818_s28 = sshll.u32 %s811_s4, 4  ;;  %s819_s28 = int_to_ptr.vmem [resolvable:$true] %s818_s28 }
 0x11a   : > { %s5086_s13 = scalar_lea.hbm %s5805_s9, %s4967_s26  ;;  %s4168_s2 = scalar_lea.hbm %s5805_s9, 32 }
 0x11b   : > { %s4163_s19 = scalar_lea.hbm %s5086_s13, 16  ;;  %p4169_p0 = scmp.lt.u32.totalorder %s5086_s13, %s5805_s9 }
 0x11c   : > { %p4164_p6 = scmp.ne.s32.totalorder %s5086_s13, %s4163_s19  ;;  %p4170_p1 = scmp.lt.u32.totalorder %s4168_s2, %s4163_s19 }
 0x11d   : > { %p4172_p8 = scmp.lt.u32.totalorder %s4163_s19, %s5086_s13 }
 0x11e   : > { %p4166_p3 = pnand %p4164_p6, %p4881_p13  ;;  %p4171_p7 = por %p4170_p1, %p4169_p0 }
 0x120   : > { %p4167_p9 = pneg %p4166_p3  ;;  %p4173_p2 = por %p4172_p8, %p4171_p7 }
 0x122   : > { %p4174_p10 = pnand %p4173_p2, %p4167_p9 }
 0x124   : > { %4177 = shalt.err (!%p4174_p10)
}
 0x125   : > { %s4178_s23 = scalar_lea.vmem %s819_s28, 16  ;;  %s4643_s4 = smov [#allocation14]  }
 0x126   : > { %p4179_p11 = scmp.ne.s32.totalorder %s819_s28, %s4178_s23  ;;  %s4183_s7 = sshll.u32 %s4643_s4, 4  ;;  %s4184_s7 = int_to_ptr.vmem [resolvable:$false] %s4183_s7 }
 0x127   : > { %s4185_s6 = scalar_lea.vmem %s4184_s7, 32  ;;  %p4186_p6 = scmp.lt.s32.totalorder %s819_s28, %s4184_s7 }
 0x128   : > { %p4181_p4 = pnand %p4179_p11, %p4881_p13  ;;  %p4187_p3 = scmp.lt.s32.totalorder %s4185_s6, %s4178_s23 }
 0x12a   : > { %p4182_p12 = pneg %p4181_p4  ;;  %p4188_p5 = por %p4187_p3, %p4186_p6 }
 0x12c   : > { %p4189_p0 = pnand %p4188_p5, %p4182_p12 }
 0x12e   : > { %4192 = shalt.err (!%p4189_p0)
}
 0x12f   : > { %p5806_p1 = scmp.ne.s32.totalorder %s5788_s5, 0  ;;  %s5807_s25 = sshll.u32 %s4627_s27, 10 }
 0x130   : > { %s5808_s10 = sld [smem:[#allocation57_spill]]  ;;  %s5809_s18 = sshll.u32 %s4860_s0, 6 }
 0x131   : > { %3679 = dma.hbm_to_vmem [thread:$0]  (!%p5806_p1), %s5086_s13, 16, %s819_s28, %s4875_s29  }
 0x132   : > { %s829_s7 = scalar_lea.vmem [#allocation15], %s5809_s18 }
 0x133   : > { %s836_s23 = sshll.u32 %s829_s7, 4  ;;  %s5116_s23 = int_to_ptr.vmem [resolvable:$true] %s836_s23 }
 0x136   : > { %s5112_s21 = scalar_lea.hbm %s5808_s10, %s5807_s25  ;;  %s4198_s28 = scalar_lea.hbm %s5808_s10, 2048 }
 0x137   : > { %s4193_s4 = scalar_lea.hbm %s5112_s21, 1024  ;;  %p4199_p8 = scmp.lt.u32.totalorder %s5112_s21, %s5808_s10 }
 0x138   : > { %p4194_p5 = scmp.ne.s32.totalorder %s5112_s21, %s4193_s4  ;;  %p4200_p2 = scmp.lt.u32.totalorder %s4198_s28, %s4193_s4 }
 0x139   : > { %p4202_p11 = scmp.lt.u32.totalorder %s4193_s4, %s5112_s21 }
 0x13a   : > { %p4196_p9 = pnand %p4194_p5, %p4881_p13  ;;  %p4201_p10 = por %p4200_p2, %p4199_p8 }
 0x13c   : > { %p4197_p7 = pneg %p4196_p9  ;;  %p4203_p4 = por %p4202_p11, %p4201_p10 }
 0x13e   : > { %p4204_p12 = pnand %p4203_p4, %p4197_p7 }
 0x140   : > { %4207 = shalt.err (!%p4204_p12)
}
 0x141   : > { %s4208_s19 = scalar_lea.vmem %s5116_s23, 1024  ;;  %s4644_s2 = smov [#allocation15]  }
 0x142   : > { %p4209_p6 = scmp.ne.s32.totalorder %s5116_s23, %s4208_s19  ;;  %s4213_s18 = sshll.u32 %s4644_s2, 4  ;;  %s4214_s18 = int_to_ptr.vmem [resolvable:$false] %s4213_s18 }
 0x143   : > { %s4215_s7 = scalar_lea.vmem %s4214_s18, 2048  ;;  %p4216_p5 = scmp.lt.s32.totalorder %s5116_s23, %s4214_s18 }
 0x144   : > { %p4211_p3 = pnand %p4209_p6, %p4881_p13  ;;  %p4217_p9 = scmp.lt.s32.totalorder %s4215_s7, %s4208_s19 }
 0x146   : > { %p4212_p0 = pneg %p4211_p3  ;;  %p4218_p8 = por %p4217_p9, %p4216_p5 }
 0x148   : > { %p4219_p2 = pnand %p4218_p8, %p4212_p0 }
 0x14a   : > { %4222 = shalt.err (!%p4219_p2)
}
 0x14b   : > { %3682 = dma.hbm_to_vmem [thread:$0]  (!%p5806_p1), %s5112_s21, 1024, %s5116_s23, %s4875_s29, %s5804_s22, %s5804_s22, %s5803_s1  }
 0x14c   : > { %s5810_s11 = sld [smem:[#allocation58_spill]]  ;;  %s849_s28 = scalar_lea.vmem [#allocation16], %s4860_s0 }
 0x14d   : > { %s856_s6 = sshll.u32 %s849_s28, 4  ;;  %s857_s6 = int_to_ptr.vmem [resolvable:$true] %s856_s6 }
 0x152   : > { %s5147_s13 = scalar_lea.hbm %s5810_s11, %s4967_s26  ;;  %s4228_s21 = scalar_lea.hbm %s5810_s11, 32 }
 0x153   : > { %s4223_s25 = scalar_lea.hbm %s5147_s13, 16  ;;  %p4229_p4 = scmp.lt.u32.totalorder %s5147_s13, %s5810_s11 }
 0x154   : > { %p4224_p7 = scmp.ne.s32.totalorder %s5147_s13, %s4223_s25  ;;  %p4230_p12 = scmp.lt.u32.totalorder %s4228_s21, %s4223_s25 }
 0x155   : > { %p4232_p3 = scmp.lt.u32.totalorder %s4223_s25, %s5147_s13 }
 0x156   : > { %p4226_p10 = pnand %p4224_p7, %p4881_p13  ;;  %p4231_p6 = por %p4230_p12, %p4229_p4 }
 0x158   : > { %p4227_p11 = pneg %p4226_p10  ;;  %p4233_p0 = por %p4232_p3, %p4231_p6 }
 0x15a   : > { %p4234_p5 = pnand %p4233_p0, %p4227_p11 }
 0x15c   : > { %4237 = shalt.err (!%p4234_p5)
}
 0x15d   : > { %s4238_s7 = scalar_lea.vmem %s857_s6, 16  ;;  %s4645_s4 = smov [#allocation16]  }
 0x15e   : > { %p4239_p9 = scmp.ne.s32.totalorder %s857_s6, %s4238_s7  ;;  %s4243_s27 = sshll.u32 %s4645_s4, 4  ;;  %s4244_s27 = int_to_ptr.vmem [resolvable:$false] %s4243_s27 }
 0x15f   : > { %s4245_s28 = scalar_lea.vmem %s4244_s27, 32  ;;  %p4246_p7 = scmp.lt.s32.totalorder %s857_s6, %s4244_s27 }
 0x160   : > { %p4241_p8 = pnand %p4239_p9, %p4881_p13  ;;  %p4247_p10 = scmp.lt.s32.totalorder %s4245_s28, %s4238_s7 }
 0x162   : > { %p4242_p2 = pneg %p4241_p8  ;;  %p4248_p1 = por %p4247_p10, %p4246_p7 }
 0x164   : > { %p4249_p4 = pnand %p4248_p1, %p4242_p2 }
 0x166   : > { %4252 = shalt.err (!%p4249_p4)
}
 0x167   : > { %p5811_p12 = scmp.ne.s32.totalorder %s5788_s5, 0  ;;  %s4646_s25 = smov [#allocation5]  }
 0x168   : > { %s591_s19 = sshll.u32 %s4646_s25, 4  ;;  %s5812_s23 = sld [smem:[#allocation48_spill]]  ;;  %s592_s19 = int_to_ptr.vmem [resolvable:$true] %s591_s19 }
 0x169   : > { %3685 = dma.hbm_to_vmem [thread:$0]  (!%p5811_p12), %s5147_s13, 16, %s857_s6, %s4875_s29  }
 0x16a   : > { %p5813_p6 = scmp.ne.s32.totalorder %s5786_s3, 0 }
 0x16e   : > { %s4253_s18 = scalar_lea.hbm %s5812_s23, 64 }
 0x16f   : > { %p4254_p11 = scmp.ne.s32.totalorder %s5812_s23, %s4253_s18  ;;  %p4260_p0 = scmp.lt.u32.totalorder %s4253_s18, %s5812_s23 }
 0x171   : > { %p4256_p1 = pnand %p4254_p11, %p5813_p6 }
 0x173   : > { %p4257_p3 = pneg %p4256_p1 }
 0x175   : > { %p4262_p5 = pnand %p4260_p0, %p4257_p3 }
 0x177   : > { %4265 = shalt.err (!%p4262_p5)
}
 0x178   : > { %s4266_s13 = scalar_lea.vmem %s592_s19, 64  ;;  %p4274_p7 = scmp.lt.s32.totalorder %s592_s19, %s592_s19 }
 0x179   : > { %p4267_p9 = scmp.ne.s32.totalorder %s592_s19, %s4266_s13  ;;  %p4275_p10 = scmp.lt.s32.totalorder %s4266_s13, %s4266_s13 }
 0x17b   : > { %p4269_p8 = pnand %p4267_p9, %p5813_p6  ;;  %p4276_p4 = por %p4275_p10, %p4274_p7 }
 0x17d   : > { %p4270_p2 = pneg %p4269_p8 }
 0x17f   : > { %p4277_p12 = pnand %p4276_p4, %p4270_p2 }
 0x181   : > { %4280 = shalt.err (!%p4277_p12)
}
 0x182   : > { %s4647_s8 = smov 16   ;;  %s4648_s6 = smov 1  }
 0x183   : > { %p5814_p11 = scmp.ne.s32.totalorder %s5782_s30, 0  ;;  %s4649_s2 = smov [#allocation20]  }
 0x184   : > { %s616_s21 = sshll.u32 %s4649_s2, 4  ;;  %s4650_s18 = smov [#allocation23]   ;;  %s617_s21 = int_to_ptr.vmem [resolvable:$true] %s616_s21 }
 0x185   : > { %3636 = dma.hbm_to_vmem [thread:$0]  (!%p5814_p11), %s5812_s23, 64, %s592_s19, [#allocation6], %s4647_s8, %s4647_s8, %s4648_s6  }
 0x186   : > { %s640_s4 = sshll.u32 %s4650_s18, 4  ;;  %s5815_s15 = sld [smem:[#allocation62_spill]]  ;;  %s5186_s4 = int_to_ptr.vmem [resolvable:$true] %s640_s4 }
 0x18c   : > { %s4281_s13 = scalar_lea.hbm %s5815_s15, 16 }
 0x18d   : > { %p4282_p12 = scmp.ne.s32.totalorder %s5815_s15, %s4281_s13  ;;  %p4288_p0 = scmp.lt.u32.totalorder %s4281_s13, %s5815_s15 }
 0x18f   : > { %p4284_p1 = pnand %p4282_p12, %p5813_p6 }
 0x191   : > { %p4285_p3 = pneg %p4284_p1 }
 0x193   : > { %p4290_p5 = pnand %p4288_p0, %p4285_p3 }
 0x195   : > { %4293 = shalt.err (!%p4290_p5)
}
 0x196   : > { %s4294_s8 = scalar_lea.vmem %s617_s21, 16  ;;  %s4301_s6 = scalar_lea.vmem %s617_s21, 32 }
 0x197   : > { %p4295_p9 = scmp.ne.s32.totalorder %s617_s21, %s4294_s8  ;;  %p4302_p7 = scmp.lt.s32.totalorder %s617_s21, %s617_s21 }
 0x198   : > { %p4303_p10 = scmp.lt.s32.totalorder %s4301_s6, %s4294_s8 }
 0x199   : > { %p4297_p8 = pnand %p4295_p9, %p5813_p6 }
 0x19a   : > { %p4304_p4 = por %p4303_p10, %p4302_p7 }
 0x19b   : > { %p4298_p2 = pneg %p4297_p8 }
 0x19d   : > { %p4305_p13 = pnand %p4304_p4, %p4298_p2 }
 0x19f   : > { %4308 = shalt.err (!%p4305_p13)
}
 0x1a0   : > { %3642 = dma.hbm_to_vmem [thread:$0]  (!%p5814_p11), %s5815_s15, 16, %s617_s21, [#allocation21]  }
 0x1a1   : > { %s4309_s18 = scalar_lea.hbm %s5703_s17, 16 }
 0x1a2   : > { %p4310_p12 = scmp.ne.s32.totalorder %s5703_s17, %s4309_s18  ;;  %p4316_p13 = scmp.lt.u32.totalorder %s4309_s18, %s5703_s17 }
 0x1a4   : > { %p4312_p1 = pnand %p4310_p12, %p5813_p6 }
 0x1a6   : > { %p4313_p3 = pneg %p4312_p1 }
 0x1a8   : > { %p4318_p0 = pnand %p4316_p13, %p4313_p3 }
 0x1aa   : > { %4321 = shalt.err (!%p4318_p0)
}
 0x1ab   : > { %s4322_s21 = scalar_lea.vmem %s5186_s4, 16  ;;  %s4329_s19 = scalar_lea.vmem %s5186_s4, 32 }
 0x1ac   : > { %p4323_p5 = scmp.ne.s32.totalorder %s5186_s4, %s4322_s21  ;;  %p4330_p2 = scmp.lt.s32.totalorder %s5186_s4, %s5186_s4 }
 0x1ad   : > { %p4331_p7 = scmp.lt.s32.totalorder %s4329_s19, %s4322_s21 }
 0x1ae   : > { %p4325_p9 = pnand %p4323_p5, %p5813_p6 }
 0x1af   : > { %p4332_p10 = por %p4331_p7, %p4330_p2 }
 0x1b0   : > { %p4326_p8 = pneg %p4325_p9 }
 0x1b2   : > { %p4333_p4 = pnand %p4332_p10, %p4326_p8 }
 0x1b4   : > { %4336 = shalt.err (!%p4333_p4)
}
 0x1b5   : > { %3648 = dma.hbm_to_vmem [thread:$0]  (!%p5814_p11), %s5703_s17, 16, %s5186_s4, [#allocation24]  }
 0x1b6   : > { %s5816_s12 = sld [smem:[#allocation59_spill]]  ;;  %s866_s2 = scalar_lea.vmem [#allocation17], %s4860_s0 }
 0x1b7   : > { %s873_s18 = sshll.u32 %s866_s2, 4  ;;  %s4651_s7 = smov [#allocation19]   ;;  %s5237_s18 = int_to_ptr.vmem [resolvable:$true] %s873_s18 }
 0x1b8   : > { %s605_s27 = sshll.u32 %s4651_s7, 4  ;;  %p5817_p1 = scmp.ne.s32.totalorder %s5790_s24, 0  ;;  %s606_s27 = int_to_ptr.vmem [resolvable:$true] %s605_s27 }
 0x1bc   : > { %s5234_s25 = scalar_lea.hbm %s5816_s12, %s4967_s26  ;;  %s4342_s21 = scalar_lea.hbm %s5816_s12, 32 }
 0x1bd   : > { %s4337_s13 = scalar_lea.hbm %s5234_s25, 16  ;;  %p4343_p0 = scmp.lt.u32.totalorder %s5234_s25, %s5816_s12 }
 0x1be   : > { %p4338_p12 = scmp.ne.s32.totalorder %s5234_s25, %s4337_s13  ;;  %p4344_p5 = scmp.lt.u32.totalorder %s4342_s21, %s4337_s13 }
 0x1bf   : > { %p4346_p8 = scmp.lt.u32.totalorder %s4337_s13, %s5234_s25 }
 0x1c0   : > { %p4340_p3 = pnand %p4338_p12, %p5817_p1  ;;  %p4345_p9 = por %p4344_p5, %p4343_p0 }
 0x1c2   : > { %p4341_p13 = pneg %p4340_p3  ;;  %p4347_p2 = por %p4346_p8, %p4345_p9 }
 0x1c4   : > { %p4348_p7 = pnand %p4347_p2, %p4341_p13 }
 0x1c6   : > { %4351 = shalt.err (!%p4348_p7)
}
 0x1c7   : > { %s4352_s6 = scalar_lea.vmem %s5237_s18, 16  ;;  %s4652_s9 = smov [#allocation17]  }
 0x1c8   : > { %p4353_p10 = scmp.ne.s32.totalorder %s5237_s18, %s4352_s6  ;;  %s4357_s10 = sshll.u32 %s4652_s9, 4  ;;  %s4358_s10 = int_to_ptr.vmem [resolvable:$false] %s4357_s10 }
 0x1c9   : > { %s4359_s2 = scalar_lea.vmem %s4358_s10, 32  ;;  %p4360_p3 = scmp.lt.s32.totalorder %s5237_s18, %s4358_s10 }
 0x1ca   : > { %p4355_p4 = pnand %p4353_p10, %p5817_p1  ;;  %p4361_p11 = scmp.lt.s32.totalorder %s4359_s2, %s4352_s6 }
 0x1cc   : > { %p4356_p12 = pneg %p4355_p4  ;;  %p4362_p0 = por %p4361_p11, %p4360_p3 }
 0x1ce   : > { %p4363_p5 = pnand %p4362_p0, %p4356_p12 }
 0x1d0   : > { %4366 = shalt.err (!%p4363_p5)
}
 0x1d1   : > { %p5818_p13 = scmp.ne.s32.totalorder %s5788_s5, 0  ;;  %s5819_s14 = sld [smem:[#allocation61_spill]] }
 0x1d3   : > { %3688 = dma.hbm_to_vmem [thread:$0]  (!%p5818_p13), %s5234_s25, 16, %s5237_s18, %s4875_s29  }
 0x1d7   : > { %s4367_s4 = scalar_lea.hbm %s5819_s14, 16 }
 0x1d8   : > { %p4368_p9 = scmp.ne.s32.totalorder %s5819_s14, %s4367_s4  ;;  %p4374_p2 = scmp.lt.u32.totalorder %s4367_s4, %s5819_s14 }
 0x1da   : > { %p4370_p11 = pnand %p4368_p9, %p5813_p6 }
 0x1dc   : > { %p4371_p8 = pneg %p4370_p11 }
 0x1de   : > { %p4376_p7 = pnand %p4374_p2, %p4371_p8 }
 0x1e0   : > { %4379 = shalt.err (!%p4376_p7)
}
 0x1e1   : > { %s4380_s6 = scalar_lea.vmem %s606_s27, 16  ;;  %s4387_s25 = scalar_lea.vmem %s606_s27, 32 }
 0x1e2   : > { %p4381_p10 = scmp.ne.s32.totalorder %s606_s27, %s4380_s6  ;;  %p4388_p3 = scmp.lt.s32.totalorder %s606_s27, %s606_s27 }
 0x1e3   : > { %p4389_p0 = scmp.lt.s32.totalorder %s4387_s25, %s4380_s6 }
 0x1e4   : > { %p4383_p4 = pnand %p4381_p10, %p5813_p6 }
 0x1e5   : > { %p4390_p5 = por %p4389_p0, %p4388_p3 }
 0x1e6   : > { %p4384_p12 = pneg %p4383_p4 }
 0x1e8   : > { %p4391_p13 = pnand %p4390_p5, %p4384_p12 }
 0x1ea   : > { %4394 = shalt.err (!%p4391_p13)
}
 0x1eb   : > { %p5820_p9 = scmp.ne.s32.totalorder %s5782_s30, 0  ;;  %s4653_s10 = smov [#allocation22]  }
 0x1ec   : > { %s626_s2 = sshll.u32 %s4653_s10, 4  ;;  %s4654_s7 = smov [#allocation25]   ;;  %s627_s2 = int_to_ptr.vmem [resolvable:$true] %s626_s2 }
 0x1ed   : > { %3639 = dma.hbm_to_vmem [thread:$0]  (!%p5820_p9), %s5819_s14, 16, %s606_s27, [#allocation6]  }
 0x1ee   : > { %s650_s13 = sshll.u32 %s4654_s7, 4  ;;  %s5821_s21 = sld [smem:[#allocation63_spill]]  ;;  %s651_s13 = int_to_ptr.vmem [resolvable:$true] %s650_s13 }
 0x1f4   : > { %s4395_s19 = scalar_lea.hbm %s5821_s21, 1024 }
 0x1f5   : > { %p4396_p13 = scmp.ne.s32.totalorder %s5821_s21, %s4395_s19  ;;  %p4402_p2 = scmp.lt.u32.totalorder %s4395_s19, %s5821_s21 }
 0x1f7   : > { %p4398_p11 = pnand %p4396_p13, %p5813_p6 }
 0x1f9   : > { %p4399_p8 = pneg %p4398_p11 }
 0x1fb   : > { %p4404_p7 = pnand %p4402_p2, %p4399_p8 }
 0x1fd   : > { %4407 = shalt.err (!%p4404_p7)
}
 0x1fe   : > { %s4408_s27 = scalar_lea.vmem %s627_s2, 1024  ;;  %p4416_p3 = scmp.lt.s32.totalorder %s627_s2, %s627_s2 }
 0x1ff   : > { %p4409_p10 = scmp.ne.s32.totalorder %s627_s2, %s4408_s27  ;;  %p4417_p0 = scmp.lt.s32.totalorder %s4408_s27, %s4408_s27 }
 0x201   : > { %p4411_p4 = pnand %p4409_p10, %p5813_p6  ;;  %p4418_p5 = por %p4417_p0, %p4416_p3 }
 0x203   : > { %p4412_p12 = pneg %p4411_p4 }
 0x205   : > { %p4419_p1 = pnand %p4418_p5, %p4412_p12 }
 0x207   : > { %4422 = shalt.err (!%p4419_p1)
}
 0x208   : > { %3645 = dma.hbm_to_vmem [thread:$0]  (!%p5820_p9), %s5821_s21, 1024, %s627_s2, [#allocation21], %s5804_s22, %s5804_s22, %s5803_s1  }
 0x209   : > { %s5822_s28 = sld [smem:[#allocation64_spill]] }
 0x20f   : > { %s4423_s19 = scalar_lea.hbm %s5822_s28, 1024 }
 0x210   : > { %p4424_p13 = scmp.ne.s32.totalorder %s5822_s28, %s4423_s19  ;;  %p4430_p8 = scmp.lt.u32.totalorder %s4423_s19, %s5822_s28 }
 0x212   : > { %p4426_p1 = pnand %p4424_p13, %p5813_p6 }
 0x214   : > { %p4427_p11 = pneg %p4426_p1 }
 0x216   : > { %p4432_p2 = pnand %p4430_p8, %p4427_p11 }
 0x218   : > { %4435 = shalt.err (!%p4432_p2)
}
 0x219   : > { %s4436_s27 = scalar_lea.vmem %s651_s13, 1024  ;;  %p4444_p12 = scmp.lt.s32.totalorder %s651_s13, %s651_s13 }
 0x21a   : > { %p4437_p7 = scmp.ne.s32.totalorder %s651_s13, %s4436_s27  ;;  %p4445_p3 = scmp.lt.s32.totalorder %s4436_s27, %s4436_s27 }
 0x21c   : > { %p4439_p10 = pnand %p4437_p7, %p5813_p6  ;;  %p4446_p0 = por %p4445_p3, %p4444_p12 }
 0x21e   : > { %p4440_p4 = pneg %p4439_p10 }
 0x220   : > { %p4447_p5 = pnand %p4446_p0, %p4440_p4 }
 0x222   : > { %4450 = shalt.err (!%p4447_p5)
}
 0x223   : > { %3651 = dma.hbm_to_vmem [thread:$0]  (!%p5820_p9), %s5822_s28, 1024, %s651_s13, [#allocation24], %s5804_s22, %s5804_s22, %s5803_s1  }
 0x224   : > { %s4655_s10 = smov [#allocation26]   ;;  %s5823_s8 = sld [smem:[#allocation60_spill]] }
 0x225   : > { %s664_s7 = sshll.u32 %s4655_s10, 4  ;;  %s5824_s27 = sld [smem:[#allocation65_spill]]  ;;  %s665_s7 = int_to_ptr.vmem [resolvable:$true] %s664_s7 }
 0x22a   : > { %s5325_s6 = scalar_lea.hbm %s5823_s8, %s4967_s26 }
 0x22b   : > { %s5825_s11 = smov %s5824_s27  ;;  %s4451_s12 = scalar_lea.hbm %s5824_s27, 16 }
 0x22c   : > { %p4452_p13 = scmp.ne.s32.totalorder %s5825_s11, %s4451_s12  ;;  %p4458_p8 = scmp.lt.u32.totalorder %s4451_s12, %s5825_s11 }
 0x22e   : > { %p4454_p1 = pnand %p4452_p13, %p5813_p6 }
 0x230   : > { %p4455_p11 = pneg %p4454_p1 }
 0x232   : > { %p4460_p2 = pnand %p4458_p8, %p4455_p11 }
 0x234   : > { %4463 = shalt.err (!%p4460_p2)
}
 0x235   : > { %s4464_s13 = scalar_lea.vmem %s665_s7, 16  ;;  %s4471_s26 = scalar_lea.vmem %s665_s7, 32 }
 0x236   : > { %p4465_p7 = scmp.ne.s32.totalorder %s665_s7, %s4464_s13  ;;  %p4472_p12 = scmp.lt.s32.totalorder %s665_s7, %s665_s7 }
 0x237   : > { %p4473_p3 = scmp.lt.s32.totalorder %s4471_s26, %s4464_s13 }
 0x238   : > { %p4467_p10 = pnand %p4465_p7, %p5813_p6 }
 0x239   : > { %p4474_p0 = por %p4473_p3, %p4472_p12 }
 0x23a   : > { %p4468_p4 = pneg %p4467_p10 }
 0x23c   : > { %p4475_p5 = pnand %p4474_p0, %p4468_p4 }
 0x23e   : > { %4478 = shalt.err (!%p4475_p5)
}
 0x23f   : > { %3654 = dma.hbm_to_vmem [thread:$0]  (!%p5820_p9), %s5825_s11, 16, %s665_s7, [#allocation27]  }
 0x240   : > { %s883_s12 = scalar_lea.vmem [#allocation18], %s4860_s0  ;;  %s4479_s2 = scalar_lea.hbm %s5325_s6, 16 }
 0x241   : > { %s890_s3 = sshll.u32 %s883_s12, 4  ;;  %p4480_p6 = scmp.ne.s32.totalorder %s5325_s6, %s4479_s2  ;;  %s891_s3 = int_to_ptr.vmem [resolvable:$true] %s890_s3 }
 0x242   : > { %p5826_p13 = scmp.ne.s32.totalorder %s5790_s24, 0  ;;  %s4484_s10 = scalar_lea.hbm %s5823_s8, 32 }
 0x243   : > { %p4485_p8 = scmp.lt.u32.totalorder %s5325_s6, %s5823_s8  ;;  %p4486_p2 = scmp.lt.u32.totalorder %s4484_s10, %s4479_s2 }
 0x244   : > { %p4482_p1 = pnand %p4480_p6, %p5826_p13  ;;  %p4488_p10 = scmp.lt.u32.totalorder %s4479_s2, %s5325_s6 }
 0x245   : > { %p4487_p7 = por %p4486_p2, %p4485_p8 }
 0x246   : > { %p4483_p11 = pneg %p4482_p1 }
 0x247   : > { %p4489_p9 = por %p4488_p10, %p4487_p7 }
 0x249   : > { %p4490_p4 = pnand %p4489_p9, %p4483_p11 }
 0x24b   : > { %4493 = shalt.err (!%p4490_p4)
}
 0x24c   : > { %s4494_s0 = scalar_lea.vmem %s891_s3, 16  ;;  %s4656_s7 = smov [#allocation18]  }
 0x24d   : > { %p4495_p12 = scmp.ne.s32.totalorder %s891_s3, %s4494_s0  ;;  %s4499_s25 = sshll.u32 %s4656_s7, 4  ;;  %s4500_s25 = int_to_ptr.vmem [resolvable:$false] %s4499_s25 }
 0x24e   : > { %s4501_s18 = scalar_lea.vmem %s4500_s25, 32  ;;  %p4502_p5 = scmp.lt.s32.totalorder %s891_s3, %s4500_s25 }
 0x24f   : > { %p4497_p3 = pnand %p4495_p12, %p5826_p13  ;;  %p4503_p6 = scmp.lt.s32.totalorder %s4501_s18, %s4494_s0 }
 0x251   : > { %p4498_p0 = pneg %p4497_p3  ;;  %p4504_p1 = por %p4503_p6, %p4502_p5 }
 0x253   : > { %p4505_p2 = pnand %p4504_p1, %p4498_p0 }
 0x255   : > { %4508 = shalt.err (!%p4505_p2)
}
 0x256   : > { %p5827_p8 = scmp.ne.s32.totalorder %s5788_s5, 0  ;;  %s5828_s27 = sld [smem:[#allocation44_spill]] }
 0x258   : > { %3691 = dma.hbm_to_vmem [thread:$0]  (!%p5827_p8), %s5325_s6, 16, %s891_s3, %s4875_s29  }
 0x25c   : > { %p5829_p11 = scmp.ne.s32.totalorder %s5828_s27, 0 }
 0x25d   : > { %s5830_s24 = sld [smem:[#allocation42_spill]] (!%p5829_p11) }
 0x25e   : > { %899 = sbr.rel (%p5829_p11) target bundleno = 3823 (0xeef), region = 100 }
 0x263   : > { %p5831_p13 = scmp.eq.s32.totalorder (!%p5829_p11), %s5830_s24, 0 }
 0x265   : > { %4578 = dma.done.wait (%p5831_p13), [#allocation3], 256   ;;  %p5832_p7 = pmov %p5831_p13 }
 0x267   : > { %4580 = vsyncadd (%p5832_p7), [#allocation3], 4294967040  ;;  %p5833_p10 = pmov %p5832_p7 }
 0x268   : > { %p5834_p9 = pmov %p5832_p7 }
 0x269   : > { %4582 = dma.done.wait (%p5833_p10), [#allocation6], 64  }
 0x26a   : > { %4584 = vsyncadd (%p5834_p9), [#allocation6], 4294967232  ;;  %s5835_s5 = sld [smem:[#allocation40_spill]]  ;;  %s5836_s1 = sld [smem:[#allocation43_spill]] }
 0x26b   : > { %s909_s22 = sand.u32 1, %s5830_s24  }
 0x26c   : > { %s910_s13 = scalar_lea.sflag [#allocation3], %s909_s22 }
 0x270   : > { %s5376_s29 = sand.u32 1, %s5835_s5   ;;  %p5837_p4 = scmp.ne.s32.totalorder %s5836_s1, 0 }
 0x271   : > { %s3564_s6 = smul.u32 384, %s5376_s29 }
 0x273   : > { %s5379_s26 = scalar_lea.vmem [#allocation7], %s3564_s6 }
 0x274   : > { %4586 = dma.done.wait (%p5837_p4), %s910_s13, 10448  }
 0x275   : > { %4588 = vsyncadd (%p5837_p4), %s910_s13, 4294956848  ;;  %s3565_s14 = smul.u32 6, %s5376_s29  ;;  %s3222_s15 = sshll.u32 %s5376_s29, 7 }
 0x276   : > { %s3223_s12 = sshll.u32 %s5376_s29, 6  ;;  %s5390_s2 = scalar_lea.vmem [#allocation9], %s3222_s15 }
 0x277   : > { %s5388_s3 = scalar_lea.vmem [#allocation8], %s3565_s14  ;;  %s939_s9 = scalar_lea.vmem [#allocation10], %s5376_s29 }
 0x278   : > { %s947_s30 = scalar_lea.vmem [#allocation11], %s5376_s29  ;;  %s955_s10 = scalar_lea.vmem [#allocation12], %s5376_s29 }
 0x279   : > { %s5395_s4 = scalar_lea.vmem [#allocation13], %s3223_s12  ;;  %s972_s19 = scalar_lea.vmem [#allocation14], %s5376_s29 }
 0x27a   : > { %s5398_s0 = scalar_lea.vmem [#allocation15], %s3223_s12  ;;  %s989_s7 = scalar_lea.vmem [#allocation16], %s5376_s29 }
 0x27b   : > { %s997_s25 = scalar_lea.vmem [#allocation17], %s5376_s29  ;;  %s1005_s18 = scalar_lea.vmem [#allocation18], %s5376_s29 }
 0x27c   : > { %p5838_p12 = pmov %p5832_p7 }
 0x27d   : > { %p5839_p3 = pmov %p5832_p7 }
 0x27e   : > { %4590 = dma.done.wait (%p5838_p12), [#allocation6], 16  }
 0x27f   : > { %4592 = vsyncadd (%p5839_p3), [#allocation6], 4294967280  ;;  %p5840_p0 = pmov %p5839_p3 }
 0x281   : > { %4594 = dma.done.wait (%p5840_p0), [#allocation21], 1040   ;;  %p5841_p5 = pmov %p5840_p0 }
 0x282   : > { %p5842_p6 = pmov %p5840_p0 }
 0x283   : > { %4596 = vsyncadd (%p5841_p5), [#allocation21], 4294966256 }
 0x284   : > { %4598 = dma.done.wait (%p5842_p6), [#allocation24], 1040   ;;  %p5843_p1 = pmov %p5840_p0 }
 0x285   : > { %p5844_p2 = pmov %p5840_p0 }
 0x286   : > { %4600 = vsyncadd (%p5843_p1), [#allocation24], 4294966256 }
 0x287   : > { %4602 = dma.done.wait (%p5844_p2), [#allocation27], 16   ;;  %p5845_p8 = pmov %p5840_p0 }
 0x288   : > { %v1132_v0 = vlaneseq  ;;  %v4657_v2 = vmov 0.0   ;;  %p5846_p11 = scmp.ne.s32.totalorder %s5830_s24, 0 }
 0x289   : > { %4604 = vsyncadd (%p5845_p8), [#allocation27], 4294967280  ;;  %v1141_v4 = vld [vmem:[#allocation2] sm:$0xff] (!%p5846_p11)  ;;  %v1142_v5 = vld [vmem:[#allocation2 + $0x8] sm:$0xff] (!%p5846_p11)  ;;  %v4658_v16 = vmov (!%p5846_p11), 0.0  }
 0x28a   : > { %v1133_v1 = vand.u32 127, %v1132_v0  ;;  %1140 = sbr.rel (%p5846_p11) target bundleno = 968 (0x3c8), region = 184  ;;  %1145 = vadd.xlane.f32.xlu0 (!%p5846_p11), %v1141_v4  ;;  %1187 = vst [vmem:[#allocation29] sm:$0x3] (!%p5846_p11), %v4658_v16  ;;  %v3233_v24 = vld [vmem:[#allocation19] ss:$0 sm:$0xff] (!%p5846_p11) }
 0x28b   : > { %v3234_v26 = vld [vmem:[#allocation20] ss:$0 sm:$0xff] (!%p5846_p11) }
 0x28c   : > { %vm1134_vm0 = vcmp.lt.s32.totalorder %v1133_v1, 32 }
 0x28d   : > { %v5421_v3 = vsel %vm1134_vm0, 1.0, %v4657_v2 }
 0x28e   : > { %1147 = vadd.xlane.f32.xlu0 (!%p5846_p11), %v1142_v5 }
 0x317   : > { %v1146_v6 = vpop.xlane.xlu0 %1145 }
 0x318   : > { %v1149_v7 = vmul.f32 0.03125, %v1146_v6 }
 0x31a   : > { %v1151_v8 = vsub.f32 %v1141_v4, %v1149_v7 }
 0x31b   : > { %v1148_v9 = vpop.xlane.xlu0 %1147 }
 0x31c   : > { %v1150_v10 = vmul.f32 0.03125, %v1148_v9  ;;  %v1153_v11 = vmul.f32 %v5421_v3, %v1151_v8 }
 0x31e   : > { %v1152_v12 = vsub.f32 %v1142_v5, %v1150_v10  ;;  %v1155_v13 = vmul.f32 %v1153_v11, %v1153_v11 }
 0x320   : > { %v1154_v14 = vmul.f32 %v5421_v3, %v1152_v12  ;;  %1157 = vadd.xlane.f32.xlu1 %v1155_v13 }
 0x322   : > { %v1156_v15 = vmul.f32 %v1154_v14, %v1154_v14 }
 0x324   : > { %1159 = vadd.xlane.f32.xlu1 %v1156_v15 }
 0x3ad   : > { %v1158_v17 = vpop.xlane.xlu1 %1157 }
 0x3ae   : > { %v1161_v18 = vmul.f32 0.03125, %v1158_v17 }
 0x3b0   : > { %v1163_v19 = vadd.f32 1e-12, %v1161_v18 }
 0x3b1   : > { %v1160_v20 = vpop.xlane.xlu1 %1159 }
 0x3b2   : > { %3771 = vrsqrt.f32 %v1163_v19  ;;  %v1162_v21 = vmul.f32 0.03125, %v1160_v20 }
 0x3b4   : > { %v1164_v22 = vadd.f32 1e-12, %v1162_v21 }
 0x3b6   : > { %3773 = vrsqrt.f32 %v1164_v22 }
 0x3bc   : > { %v3772_v23 = vpop.eup %3771 }
 0x3bd   : > { %v1167_v25 = vmul.f32 %v3772_v23, %v1153_v11 }
 0x3bf   : > { %v1175_v27 = vmul.f32 %v3233_v24, %v1167_v25 }
 0x3c0   : > { %v3774_v28 = vpop.eup %3773 }
 0x3c1   : > { %v1183_v29 = vadd.f32 %v3234_v26, %v1175_v27  ;;  %v1168_v30 = vmul.f32 %v3774_v28, %v1154_v14 }
 0x3c3   : > { %1185 = vst [vmem:[#allocation28] sm:$0xff] %v1183_v29  ;;  %v1176_v31 = vmul.f32 %v3233_v24, %v1168_v30 }
 0x3c5   : > { %v1184_v32 = vadd.f32 %v3234_v26, %v1176_v31 }
 0x3c7   : > { %1186 = vst [vmem:[#allocation28 + $0x8] sm:$0xff] %v1184_v32 }
 0x3c8 PF: > { %v3775_v33 = vld [vmem:[%s5379_s26 + $0xc] ss:$24 sps:$4 sm:$0xff]   ;;  %v3777_v34 = vld [vmem:[%s5379_s26 + $0x8] ss:$24 sps:$4 sm:$0xff]   ;;  %v4659_v35 = vmov 0   ;;  %vm4660_vm1 = vmmov 0  }
 0x3c9   : > { %1586 = vmatprep.mubr.bf16.mxu1 %v4659_v35  ;;  %1543 = vmatprep.mubr.bf16.mxu0 %v4659_v35  ;;  %v3778_v36 = vld [vmem:[%s5379_s26 + $0x3c] ss:$24 sps:$4 sm:$0xff]   ;;  %v3782_v38 = vld [vmem:[%s5379_s26 + $0x38] ss:$24 sps:$4 sm:$0xff]   ;;  %v3784_v40 = vld [vmem:[%s5379_s26 + $0x6c] ss:$24 sps:$4 sm:$0xff]  }
 0x3ca   : > { %1554 = vmatprep.subr.bf16.mxu1 %v3775_v33  ;;  %v3780_v37 = vld [vmem:[%s5379_s26 + $0x4] ss:$24 sps:$4 sm:$0xff]   ;;  %v3783_v39 = vld [vmem:[%s5379_s26] ss:$24 sps:$4 sm:$0xff]   ;;  %v3786_v41 = vld [vmem:[%s5379_s26 + $0x34] ss:$24 sps:$4 sm:$0xff]  }
 0x3cb   : > { %1555 = vmatpush1.bf16.msra.mxu1 %v3777_v34  ;;  %1511 = vmatprep.subr.bf16.mxu0 %v3780_v37  ;;  %v3789_v42 = vld [vmem:[%s5379_s26 + $0x30] ss:$24 sps:$4 sm:$0xff]   ;;  %v3790_v44 = vld [vmem:[%s5379_s26 + $0x9c] ss:$24 sps:$4 sm:$0xff]   ;;  %v3795_v46 = vld [vmem:[%s5379_s26 + $0x60] ss:$24 sps:$4 sm:$0xff]  }
 0x3cc   : > { %1556 = vmatprep.subr.bf16.mxu1 %v3778_v36  ;;  %1512 = vmatpush1.bf16.msra.mxu0 %v3783_v39  ;;  %v3788_v43 = vld [vmem:[%s5379_s26 + $0x68] ss:$24 sps:$4 sm:$0xff]   ;;  %v3792_v45 = vld [vmem:[%s5379_s26 + $0x64] ss:$24 sps:$4 sm:$0xff]   ;;  %v3794_v47 = vld [vmem:[%s5379_s26 + $0x98] ss:$24 sps:$4 sm:$0xff]  }
 0x3cd   : > { %1513 = vmatprep.subr.bf16.mxu0 %v3786_v41  ;;  %v3798_v48 = vld [vmem:[%s5379_s26 + $0x94] ss:$24 sps:$4 sm:$0xff]   ;;  %v3800_v50 = vld [vmem:[%s5379_s26 + $0xc8] ss:$24 sps:$4 sm:$0xff]   ;;  %v3804_v52 = vld [vmem:[%s5379_s26 + $0xc4] ss:$24 sps:$4 sm:$0xff]  }
 0x3ce   : > { %v3796_v49 = vld [vmem:[%s5379_s26 + $0xcc] ss:$24 sps:$4 sm:$0xff]   ;;  %v3801_v51 = vld [vmem:[%s5379_s26 + $0x90] ss:$24 sps:$4 sm:$0xff]   ;;  %v3802_v53 = vld [vmem:[%s5379_s26 + $0xfc] ss:$24 sps:$4 sm:$0xff]  }
 0x3cf   : > { %1557 = vmatpush1.bf16.msra.mxu1 %v3782_v38  ;;  %v3807_v54 = vld [vmem:[%s5379_s26 + $0xc0] ss:$24 sps:$4 sm:$0xff]   ;;  %v3810_v56 = vld [vmem:[%s5379_s26 + $0xf4] ss:$24 sps:$4 sm:$0xff]   ;;  %v3813_v59 = vld [vmem:[%s5379_s26 + $0xf0] ss:$24 sps:$4 sm:$0xff]  }
 0x3d0   : > { %1558 = vmatprep.subr.bf16.mxu1 %v3784_v40  ;;  %1514 = vmatpush1.bf16.msra.mxu0 %v3789_v42  ;;  %v3806_v55 = vld [vmem:[%s5379_s26 + $0xf8] ss:$24 sps:$4 sm:$0xff]   ;;  %v3808_v57 = vld [vmem:[%s5379_s26 + $0x12c] ss:$24 sps:$4 sm:$0xff]   ;;  %v3812_v58 = vld [vmem:[%s5379_s26 + $0x128] ss:$24 sps:$4 sm:$0xff]  }
 0x3d1   : > { %1515 = vmatprep.subr.bf16.mxu0 %v3792_v45  ;;  %v3814_v60 = vld [vmem:[%s5379_s26 + $0x15c] ss:$24 sps:$4 sm:$0xff]   ;;  %v3819_v62 = vld [vmem:[%s5379_s26 + $0x120] ss:$24 sps:$4 sm:$0xff]   ;;  %v5461_v4 = vld [vmem:[#allocation28 + $0x8] sm:$0xff]  ;;  %v5476_v8 = vshrl.u32 %v1132_v0, 7 }
 0x3d2   : > { %v3816_v61 = vld [vmem:[%s5379_s26 + $0x124] ss:$24 sps:$4 sm:$0xff]   ;;  %v3818_v63 = vld [vmem:[%s5379_s26 + $0x158] ss:$24 sps:$4 sm:$0xff]   ;;  %v3820_v5 = vld [vmem:[%s5379_s26 + $0x154] ss:$24 sps:$4 sm:$0xff]  }
 0x3d3   : > { %1559 = vmatpush1.bf16.msra.mxu1 %v3788_v43  ;;  %v5459_v1 = vld [vmem:[#allocation28] sm:$0xff]  ;;  %v1251_v9 = vsub.s32 2, %v5476_v8  ;;  %v1243_v11 = vsub.s32 0, %v5476_v8  ;;  %v1255_v24 = vsub.s32 3, %v5476_v8  ;;  %v1247_v29 = vsub.s32 1, %v5476_v8  ;;  %s5847_s27 = sld [smem:[#allocation42_spill]] }
 0x3d4   : > { %1560 = vmatprep.subr.bf16.mxu1 %v3790_v44  ;;  %1516 = vmatpush1.bf16.msra.mxu0 %v3795_v46  ;;  %v3822_v6 = vld [vmem:[%s5379_s26 + $0x150] ss:$24 sps:$4 sm:$0xff]   ;;  %v5467_v7 = vpack.c.bf16 %v5461_v4, %v5459_v1  ;;  %v3825_v42 = vld [vmem:[%s5379_s26 + $0x14] ss:$24 sps:$4 sm:$0xff]   ;;  %v3828_v43 = vld [vmem:[%s5379_s26 + $0x44] ss:$24 sps:$4 sm:$0xff]  }
 0x3d5   : > { %1517 = vmatprep.subr.bf16.mxu0 %v3798_v48  ;;  %v5480_v10 = vld [vmem:[%s5388_s3] sm:$0x3f]  ;;  %v3831_v45 = vld [vmem:[%s5379_s26 + $0x74] ss:$24 sps:$4 sm:$0xff]   ;;  %vm1848_vm2 = vcmask 64512   ;;  %vm1900_vm3 = vcmask 1043456  }
 0x3d6   : > { %v1252_v12 = vrot.slane %v5480_v10, %v1251_v9  ;;  %v1244_v14 = vrot.slane %v5480_v10, %v1243_v11  ;;  %v1256_v27 = vrot.slane %v5480_v10, %v1255_v24  ;;  %v1248_v32 = vrot.slane %v5480_v10, %v1247_v29  ;;  %v3823_v41 = vld [vmem:[%s5379_s26 + $0x10] ss:$24 sps:$4 sm:$0xff]   ;;  %v3826_v44 = vld [vmem:[%s5379_s26 + $0x40] ss:$24 sps:$4 sm:$0xff]   ;;  %v3284_v9 = vld [vmem:[#allocation5 + $0x1] ss:$0 sm:$0xff] }
 0x3d7   : > { %1561 = vmatpush1.bf16.msra.mxu1 %v3794_v47  ;;  %v3829_v46 = vld [vmem:[%s5379_s26 + $0x70] ss:$24 sps:$4 sm:$0xff]   ;;  %v3834_v47 = vld [vmem:[%s5379_s26 + $0xa4] ss:$24 sps:$4 sm:$0xff]   ;;  %v3832_v48 = vld [vmem:[%s5379_s26 + $0xa0] ss:$24 sps:$4 sm:$0xff]  }
 0x3d8   : > { %1562 = vmatprep.subr.bf16.mxu1 %v3796_v49  ;;  %1518 = vmatpush1.bf16.msra.mxu0 %v3801_v51  ;;  %v3837_v49 = vld [vmem:[%s5379_s26 + $0xd4] ss:$24 sps:$4 sm:$0xff]   ;;  %v3840_v51 = vld [vmem:[%s5379_s26 + $0x104] ss:$24 sps:$4 sm:$0xff]  }
 0x3d9   : > { %1519 = vmatprep.subr.bf16.mxu0 %v3804_v52  ;;  %v3838_v52 = vld [vmem:[%s5379_s26 + $0x100] ss:$24 sps:$4 sm:$0xff]   ;;  %v3286_v24 = vld [vmem:[#allocation5 + $0x3] ss:$0 sm:$0xff]  ;;  %p3330_p13 = scmp.ne.s32.totalorder %s5847_s27, 1 }
 0x3da   : > { %vm4662_vm4 = vmmov (!%p3330_p13), 0   ;;  %vm2628_vm5 = vcmask (!%p3330_p13), 1041409  }
 0x3db   : > { %1563 = vmatpush1.bf16.msra.mxu1 %v3800_v50  ;;  %v3835_v50 = vld [vmem:[%s5379_s26 + $0xd0] ss:$24 sps:$4 sm:$0xff]  }
 0x3dc   : > { %1564 = vmatprep.subr.bf16.mxu1 %v3802_v53  ;;  %1520 = vmatpush1.bf16.msra.mxu0 %v3807_v54  ;;  %v3843_v53 = vld [vmem:[%s5379_s26 + $0x134] ss:$24 sps:$4 sm:$0xff]   ;;  %v3841_v54 = vld [vmem:[%s5379_s26 + $0x130] ss:$24 sps:$4 sm:$0xff]  }
 0x3dd   : > { %1521 = vmatprep.subr.bf16.mxu0 %v3810_v56  ;;  %v3844_v56 = vld [vmem:[%s5379_s26 + $0x160] ss:$24 sps:$4 sm:$0xff]  }
 0x3df   : > { %1565 = vmatpush1.bf16.msra.mxu1 %v3806_v55  ;;  %v3846_v55 = vld [vmem:[%s5379_s26 + $0x164] ss:$24 sps:$4 sm:$0xff]  }
 0x3e0   : > { %1566 = vmatprep.subr.bf16.mxu1 %v3808_v57  ;;  %1522 = vmatpush1.bf16.msra.mxu0 %v3813_v59 }
 0x3e1   : > { %1523 = vmatprep.subr.bf16.mxu0 %v3816_v61 }
 0x3e3   : > { %1567 = vmatpush1.bf16.msra.mxu1 %v3812_v58  ;;  %v3283_v58 = vld [vmem:[#allocation5] ss:$0 sm:$0xff] }
 0x3e4   : > { %1568 = vmatprep.subr.bf16.mxu1 %v3814_v60  ;;  %1524 = vmatpush1.bf16.msra.mxu0 %v3819_v62 }
 0x3e5   : > { %1525 = vmatprep.subr.bf16.mxu0 %v3820_v5 }
 0x3e7   : > { %1569 = vmatpush1.bf16.msra.mxu1 %v3818_v63 }
 0x3e8   : > { %3432 = vmatprep.subr.bf16.mxu1 %v4657_v2  ;;  %1526 = vmatpush1.bf16.msra.mxu0 %v3822_v6 }
 0x3e9   : > { %1597 = vmatprep.subr.bf16.mxu0 %v3825_v42 }
 0x3ea   : > { %1587 = vmatmul.mubr.bf16.vlgmr.msra.gmra.mrb[0].mxu1 %v5467_v7 }
 0x3eb   : > { %1544 = vmatmul.mubr.bf16.vlgmr.msra.gmra.mrb[0].mxu0 %v5467_v7  ;;  %3434 = vmatprep.mubr.msk.bf16.mxu1 %vm4660_vm1, %v4657_v2 }
 0x3ec   : > { %1629 = vmatprep.mubr.bf16.mxu0 %v4659_v35  ;;  %1598 = vmatpush1.bf16.msra.mxu0 %v3823_v41 }
 0x3ed   : > { %1599 = vmatprep.subr.bf16.mxu0 %v3828_v43 }
 0x3f0   : > { %1600 = vmatpush1.bf16.msra.mxu0 %v3826_v44 }
 0x3f1   : > { %1601 = vmatprep.subr.bf16.mxu0 %v3831_v45 }
 0x3f4   : > { %1602 = vmatpush1.bf16.msra.mxu0 %v3829_v46 }
 0x3f5   : > { %1603 = vmatprep.subr.bf16.mxu0 %v3834_v47 }
 0x3f8   : > { %1604 = vmatpush1.bf16.msra.mxu0 %v3832_v48 }
 0x3f9   : > { %1605 = vmatprep.subr.bf16.mxu0 %v3837_v49 }
 0x3fc   : > { %1606 = vmatpush1.bf16.msra.mxu0 %v3835_v50 }
 0x3fd   : > { %1607 = vmatprep.subr.bf16.mxu0 %v3840_v51 }
 0x400   : > { %1608 = vmatpush1.bf16.msra.mxu0 %v3838_v52 }
 0x401   : > { %1609 = vmatprep.subr.bf16.mxu0 %v3843_v53 }
 0x404   : > { %1610 = vmatpush1.bf16.msra.mxu0 %v3841_v54 }
 0x405   : > { %1611 = vmatprep.subr.bf16.mxu0 %v3846_v55  ;;  %v1263_v55 = vsub.s32 5, %v5476_v8 }
 0x408   : > { %1612 = vmatpush1.bf16.msra.mxu0 %v3844_v56 }
 0x40b   : > { %1630 = vmatmul.mubr.bf16.vlgmr.msra.gmra.mrb[4].mxu0 %v5467_v7 }
 0x4bd   : > { %v1588_v13 = vpop.f32.mrb[0].mxu1 }
 0x4be   : > { %v1589_v15 = vadd.f32 %v1588_v13, %v1252_v12  ;;  %v1590_v16 = vpop.f32.mrb[1].mxu1  ;;  %v1545_v20 = vpop.f32.mrb[0].mxu0 }
 0x4bf   : > { %v1592_v17 = vpop.f32.mrb[2].mxu1  ;;  %v1546_v21 = vadd.f32 %v1545_v20, %v1244_v14  ;;  %v1547_v0 = vpop.f32.mrb[1].mxu0  ;;  %v1591_v31 = vadd.f32 %v1590_v16, %v1256_v27 }
 0x4c0   : > { %v1644_v18 = vpack.c.bf16 %v1589_v15, %v1589_v15  ;;  %v1594_v19 = vpop.f32.mrb[3].mxu1  ;;  %v1549_v22 = vpop.f32.mrb[2].mxu0  ;;  %v1593_v25 = vadd.f32 %v1592_v17, %v1252_v12  ;;  %v1548_v35 = vadd.f32 %v1547_v0, %v1248_v32  ;;  %v3285_v17 = vld [vmem:[#allocation5 + $0x2] ss:$0 sm:$0xff] }
 0x4c1   : > { %v1551_v23 = vpop.f32.mrb[3].mxu0  ;;  %v1640_v26 = vpack.c.bf16 %v1546_v21, %v1546_v21  ;;  %v1550_v30 = vadd.f32 %v1549_v22, %v1244_v14  ;;  %v1646_v34 = vpack.c.bf16 %v1591_v31, %v1591_v31  ;;  %v1595_v36 = vadd.f32 %v1594_v19, %v1256_v27 }
 0x4c2   : > { %3433 = vmatpush3.bf16.xpose.msra.mxu1 %v1644_v18  ;;  %v1645_v28 = vpack.c.bf16 %v1593_v25, %v1593_v25  ;;  %v1642_v37 = vpack.c.bf16 %v1548_v35, %v1548_v35  ;;  %v1552_v39 = vadd.f32 %v1551_v23, %v1248_v32  ;;  %v1259_v31 = vsub.s32 4, %v5476_v8 }
 0x4c3   : > { %3438 = vmatprep.subr.bf16.mxu1 %v4657_v2  ;;  %v1641_v33 = vpack.c.bf16 %v1550_v30, %v1550_v30  ;;  %v1647_v38 = vpack.c.bf16 %v1595_v36, %v1595_v36 }
 0x4c4   : > { %v1643_v40 = vpack.c.bf16 %v1552_v39, %v1552_v39  ;;  %v1260_v32 = vrot.slane %v5480_v10, %v1259_v31  ;;  %v3851_v31 = vld [vmem:[%s5390_s2 + $0x50] sm:$0xff]  }
 0x4c9   : > { %3435 = vmatmul.mubr.bf16.vlgmr.msra.gmra.mrb[4].mxu1 %v1640_v26 }
 0x4ca   : > { %3439 = vmatpush3.bf16.xpose.msra.mxu1 %v1645_v28  ;;  %3440 = vmatprep.mubr.msk.bf16.mxu1 %vm4660_vm1, %v4657_v2 }
 0x4cb   : > { %3444 = vmatprep.subr.bf16.mxu1 %v4657_v2 }
 0x4d1   : > { %3441 = vmatmul.mubr.bf16.vlgmr.msra.gmra.mrb[8].mxu1 %v1641_v33 }
 0x4d2   : > { %3445 = vmatpush3.bf16.xpose.msra.mxu1 %v1646_v34  ;;  %3446 = vmatprep.mubr.msk.bf16.mxu1 %vm4660_vm1, %v4657_v2 }
 0x4d3   : > { %3450 = vmatprep.subr.bf16.mxu1 %v4657_v2 }
 0x4d9   : > { %3447 = vmatmul.mubr.bf16.vlgmr.msra.gmra.mrb[12].mxu1 %v1642_v37 }
 0x4da   : > { %3451 = vmatpush3.bf16.xpose.msra.mxu1 %v1647_v38  ;;  %3452 = vmatprep.mubr.msk.bf16.mxu1 %vm4660_vm1, %v4657_v2 }
 0x4db   : > { %3456 = vmatprep.subr.bf16.mxu1 %v4657_v2 }
 0x4de   : > { %v1631_v34 = vpop.f32.mrb[4].mxu0 }
 0x4df   : > { %v1632_v36 = vadd.f32 %v1631_v34, %v1260_v32  ;;  %v1633_v56 = vpop.f32.mrb[5].mxu0  ;;  %v3854_v34 = vld [vmem:[%s5390_s2 + $0x18] sm:$0xff]  }
 0x4e1   : > { %3453 = vmatmul.mubr.bf16.vlgmr.msra.gmra.mrb[16].mxu1 %v1643_v40  ;;  %v1648_v38 = vpack.c.bf16 %v1632_v36, %v1632_v36  ;;  %v3856_v36 = vld [vmem:[%s5390_s2 + $0x20] sm:$0xff]  }
 0x4e2   : > { %3458 = vmatprep.mubr.msk.bf16.mxu1 %vm4660_vm1, %v4657_v2 }
 0x4e3   : > { %v1902_v39 = vsel %vm1900_vm3, %v1648_v38, 0  ;;  %v3858_v38 = vld [vmem:[%s5390_s2 + $0x28] sm:$0xff]  }
 0x4e4   : > { %3457 = vmatpush3.bf16.msra.mxu1 %v1902_v39  ;;  %v3859_v39 = vld [vmem:[%s5390_s2 + $0x70] sm:$0xff]  }
 0x4e5   : > { %3462 = vmatprep.subr.bf16.mxu1 %v4657_v2 }
 0x59c   : > { %v1686_v57 = vpop.f32.mrb[4].mxu1 }
 0x59d   : > { %v1812_v59 = vmul.f32 0.25, %v1686_v57  ;;  %v3436_v60 = vpop.f32.mrb[5].mxu1  ;;  %v1264_v57 = vrot.slane %v5480_v10, %v1263_v55  ;;  %v3847_v10 = vld [vmem:[%s5390_s2 + $0x40] sm:$0xff]  }
 0x59e   : > { %v1689_v61 = vpop.f32.mrb[6].mxu1  ;;  %3374 = vmatprep.subr.bf16.mxu0 %v3847_v10 }
 0x59f   : > { %v3437_v62 = vpop.f32.mrb[7].mxu1  ;;  %v1844_v63 = vadd.f32 %v3283_v58, %v1812_v59  ;;  %v1635_v58 = vpop.f32.mrb[6].mxu0  ;;  %v1634_v60 = vadd.f32 %v1633_v56, %v1264_v57 }
 0x5a0   : > { %v1637_v59 = vpop.f32.mrb[7].mxu0  ;;  %v1636_v61 = vadd.f32 %v1635_v58, %v1260_v32  ;;  %v3852_v32 = vld [vmem:[%s5390_s2 + $0x10] sm:$0xff]  }
 0x5a1   : > { %v1849_v5 = vsel %vm1848_vm2, %v1844_v63, -inf  ;;  %v1638_v62 = vadd.f32 %v1637_v59, %v1264_v57 }
 0x5a2   : > { %1850 = vmax.xlane.f32.xlu0 %v1849_v5 }
 0x5a4   : > { %v1726_v6 = vpop.f32.mrb[8].mxu1 }
 0x5a5   : > { %v1813_v11 = vmul.f32 0.25, %v1726_v6  ;;  %v3442_v12 = vpop.f32.mrb[9].mxu1  ;;  %v1650_v6 = vpack.c.bf16 %v1634_v60, %v1634_v60 }
 0x5a6   : > { %v1729_v13 = vpop.f32.mrb[10].mxu1 }
 0x5a7   : > { %v3443_v14 = vpop.f32.mrb[11].mxu1  ;;  %v1845_v15 = vadd.f32 %v3284_v9, %v1813_v11  ;;  %v1649_v9 = vpack.c.bf16 %v1636_v61, %v1636_v61  ;;  %v1651_v11 = vpack.c.bf16 %v1638_v62, %v1638_v62  ;;  %v1994_v12 = vsel %vm1900_vm3, %v1650_v6, 0  ;;  %v3291_v62 = vld [vmem:[%s939_s9] ss:$0 sm:$0xff] }
 0x5a8   : > { %v3848_v14 = vld [vmem:[%s5390_s2] sm:$0xff]  }
 0x5a9   : > { %v1852_v7 = vsel %vm1848_vm2, %v1845_v15, -inf  ;;  %v1948_v8 = vsel %vm1900_vm3, %v1649_v9, 0  ;;  %v2040_v13 = vsel %vm1900_vm3, %v1651_v11, 0  ;;  %3375 = vmatpush3.bf16.msra.mxu0 %v3848_v14  ;;  %v3863_v14 = vld [vmem:[%s5395_s4] sm:$0xff]  }
 0x5aa   : > { %1853 = vmax.xlane.f32.xlu0 %v1852_v7 }
 0x5ac   : > { %v1766_v16 = vpop.f32.mrb[12].mxu1 }
 0x5ad   : > { %v1814_v18 = vmul.f32 0.25, %v1766_v16  ;;  %v3448_v19 = vpop.f32.mrb[13].mxu1 }
 0x5ae   : > { %v1769_v20 = vpop.f32.mrb[14].mxu1 }
 0x5af   : > { %v3449_v21 = vpop.f32.mrb[15].mxu1  ;;  %v1846_v0 = vadd.f32 %v3285_v17, %v1814_v18 }
 0x5b1   : > { %v1855_v22 = vsel %vm1848_vm2, %v1846_v0, -inf }
 0x5b2   : > { %1856 = vmax.xlane.f32.xlu1 %v1855_v22 }
 0x5b4   : > { %v1806_v23 = vpop.f32.mrb[16].mxu1 }
 0x5b5   : > { %v1815_v25 = vmul.f32 0.25, %v1806_v23  ;;  %v3454_v26 = vpop.f32.mrb[17].mxu1 }
 0x5b6   : > { %v1809_v27 = vpop.f32.mrb[18].mxu1 }
 0x5b7   : > { %v3455_v28 = vpop.f32.mrb[19].mxu1  ;;  %v1847_v29 = vadd.f32 %v3286_v24, %v1815_v25 }
 0x5b9   : > { %v1858_v30 = vsel %vm1848_vm2, %v1847_v29, -inf }
 0x5ba   : > { %1859 = vmax.xlane.f32.xlu1 %v1858_v30  ;;  %v3850_v30 = vld [vmem:[%s5390_s2 + $0x8] sm:$0xff]  }
 0x62f   : > { %v1851_v33 = vpop.xlane.xlu0 %1850 }
 0x630   : > { %v1861_v35 = vsub.f32 %v1844_v63, %v1851_v33  ;;  %v3853_v33 = vld [vmem:[%s5390_s2 + $0x58] sm:$0xff]  }
 0x632   : > { %v1865_v37 = vmul.f32 1.442695, %v1861_v35  ;;  %v3855_v35 = vld [vmem:[%s5390_s2 + $0x60] sm:$0xff]  }
 0x634   : > { %3879 = vpow2.f32 %v1865_v37  ;;  %v3857_v37 = vld [vmem:[%s5390_s2 + $0x68] sm:$0xff]  }
 0x637   : > { %v1854_v40 = vpop.xlane.xlu0 %1853 }
 0x638   : > { %v1862_v41 = vsub.f32 %v1845_v15, %v1854_v40  ;;  %v3860_v40 = vld [vmem:[%s5390_s2 + $0x30] sm:$0xff]  }
 0x63a   : > { %v1867_v42 = vmul.f32 1.442695, %v1862_v41  ;;  %v3861_v41 = vld [vmem:[%s5390_s2 + $0x78] sm:$0xff]  }
 0x63c   : > { %3881 = vpow2.f32 %v1867_v42  ;;  %v3862_v42 = vld [vmem:[%s5390_s2 + $0x38] sm:$0xff]  }
 0x63e   : > { %v3880_v43 = vpop.eup %3879 }
 0x63f   : > { %v1857_v44 = vpop.xlane.xlu1 %1856  ;;  %v1873_v45 = vsel %vm1848_vm2, %v3880_v43, 0.0 }
 0x640   : > { %v1863_v46 = vsub.f32 %v1846_v0, %v1857_v44  ;;  %1874 = vadd.xlane.f32.xlu0 %v1873_v45 }
 0x642   : > { %v1869_v47 = vmul.f32 1.442695, %v1863_v46 }
 0x644   : > { %3883 = vpow2.f32 %v1869_v47 }
 0x646   : > { %v3882_v48 = vpop.eup %3881 }
 0x647   : > { %v1860_v49 = vpop.xlane.xlu1 %1859  ;;  %v1876_v50 = vsel %vm1848_vm2, %v3882_v48, 0.0 }
 0x648   : > { %v1864_v51 = vsub.f32 %v1847_v29, %v1860_v49  ;;  %1877 = vadd.xlane.f32.xlu1 %v1876_v50  ;;  %v3849_v29 = vld [vmem:[%s5390_s2 + $0x48] sm:$0xff]  }
 0x649   : > { %3376 = vmatprep.subr.bf16.mxu0 %v3849_v29 }
 0x64a   : > { %v1871_v52 = vmul.f32 1.442695, %v1864_v51  ;;  %3377 = vmatpush3.bf16.msra.mxu0 %v3850_v30 }
 0x64b   : > { %3378 = vmatprep.subr.bf16.mxu0 %v3851_v31 }
 0x64c   : > { %3885 = vpow2.f32 %v1871_v52 }
 0x64e   : > { %v3884_v53 = vpop.eup %3883  ;;  %3379 = vmatpush3.bf16.msra.mxu0 %v3852_v32 }
 0x64f   : > { %v1879_v54 = vsel %vm1848_vm2, %v3884_v53, 0.0  ;;  %3380 = vmatprep.subr.bf16.mxu0 %v3853_v33 }
 0x650   : > { %1880 = vadd.xlane.f32.xlu0 %v1879_v54 }
 0x652   : > { %3381 = vmatpush3.bf16.msra.mxu0 %v3854_v34 }
 0x653   : > { %3382 = vmatprep.subr.bf16.mxu0 %v3855_v35  ;;  %v3308_v35 = vld [vmem:[%s947_s30] ss:$0 sm:$0xff] }
 0x656   : > { %v3886_v63 = vpop.eup %3885  ;;  %3383 = vmatpush3.bf16.msra.mxu0 %v3856_v36 }
 0x657   : > { %v1882_v5 = vsel %vm1848_vm2, %v3886_v63, 0.0  ;;  %3384 = vmatprep.subr.bf16.mxu0 %v3857_v37 }
 0x658   : > { %1883 = vadd.xlane.f32.xlu1 %v1882_v5 }
 0x65a   : > { %3385 = vmatpush3.bf16.msra.mxu0 %v3858_v38 }
 0x65b   : > { %3386 = vmatprep.subr.bf16.mxu0 %v3859_v39 }
 0x65e   : > { %3387 = vmatpush3.bf16.msra.mxu0 %v3860_v40  ;;  %v3309_v40 = vld [vmem:[%s955_s10] ss:$0 sm:$0xff] }
 0x65f   : > { %3388 = vmatprep.subr.bf16.mxu0 %v3861_v41 }
 0x662   : > { %3389 = vmatpush3.bf16.msra.mxu0 %v3862_v42 }
 0x663   : > { %3500 = vmatprep.subr.bf16.mxu0 %v4657_v2 }
 0x6cd   : > { %v1875_v15 = vpop.xlane.xlu0 %1874 }
 0x6ce   : > { %3887 = vrcp.f32 %v1875_v15  ;;  %v3864_v15 = vld [vmem:[%s5395_s4 + $0x8] sm:$0xff]  }
 0x6d5   : > { %v1878_v7 = vpop.xlane.xlu1 %1877 }
 0x6d6   : > { %3889 = vrcp.f32 %v1878_v7 }
 0x6d8   : > { %v3888_v16 = vpop.eup %3887 }
 0x6d9   : > { %v1889_v17 = vmul.f32 %v3888_v16, %v3880_v43 }
 0x6db   : > { %v1893_v18 = vpack.c.bf16 %v1889_v17, %v1889_v17 }
 0x6dd   : > { %3459 = vmatmul.mubr.msk.bf16.vlgmr.msra.gmra.mrb[20].mxu1 %vm1848_vm2, %v1893_v18  ;;  %v1881_v19 = vpop.xlane.xlu0 %1880 }
 0x6de   : > { %3463 = vmatpush3.bf16.msra.mxu1 %v1948_v8  ;;  %3891 = vrcp.f32 %v1881_v19  ;;  %3464 = vmatprep.mubr.msk.bf16.mxu1 %vm4660_vm1, %v4657_v2 }
 0x6df   : > { %3468 = vmatprep.subr.bf16.mxu1 %v4657_v2 }
 0x6e0   : > { %v3890_v20 = vpop.eup %3889 }
 0x6e1   : > { %v1890_v21 = vmul.f32 %v3890_v20, %v3882_v48 }
 0x6e3   : > { %v1894_v0 = vpack.c.bf16 %v1890_v21, %v1890_v21 }
 0x6e5   : > { %3465 = vmatmul.mubr.msk.bf16.vlgmr.msra.gmra.mrb[24].mxu1 %vm1848_vm2, %v1894_v0  ;;  %v1884_v22 = vpop.xlane.xlu1 %1883 }
 0x6e6   : > { %3469 = vmatpush3.bf16.msra.mxu1 %v1994_v12  ;;  %3893 = vrcp.f32 %v1884_v22  ;;  %3470 = vmatprep.mubr.msk.bf16.mxu1 %vm4660_vm1, %v4657_v2  ;;  %v3865_v22 = vld [vmem:[%s5395_s4 + $0x10] sm:$0xff]  }
 0x6e7   : > { %3474 = vmatprep.subr.bf16.mxu1 %v4657_v2 }
 0x6e8   : > { %v3892_v23 = vpop.eup %3891 }
 0x6e9   : > { %v1891_v24 = vmul.f32 %v3892_v23, %v3884_v53  ;;  %v3866_v23 = vld [vmem:[%s5395_s4 + $0x18] sm:$0xff]  }
 0x6eb   : > { %v1895_v25 = vpack.c.bf16 %v1891_v24, %v1891_v24  ;;  %v3867_v24 = vld [vmem:[%s5395_s4 + $0x20] sm:$0xff]  }
 0x6ed   : > { %3471 = vmatmul.mubr.msk.bf16.vlgmr.msra.gmra.mrb[28].mxu1 %vm1848_vm2, %v1895_v25  ;;  %v3868_v25 = vld [vmem:[%s5395_s4 + $0x28] sm:$0xff]  }
 0x6ee   : > { %3475 = vmatpush3.bf16.msra.mxu1 %v2040_v13  ;;  %3476 = vmatprep.mubr.msk.bf16.mxu1 %vm4660_vm1, %v4657_v2 }
 0x6ef   : > { %3480 = vmatprep.subr.bf16.mxu1 %v4657_v2 }
 0x6f0   : > { %v3894_v26 = vpop.eup %3893 }
 0x6f1   : > { %v1892_v27 = vmul.f32 %v3894_v26, %v3886_v63  ;;  %v3869_v26 = vld [vmem:[%s5395_s4 + $0x30] sm:$0xff]  }
 0x6f3   : > { %v1896_v28 = vpack.c.bf16 %v1892_v27, %v1892_v27  ;;  %v3870_v27 = vld [vmem:[%s5395_s4 + $0x38] sm:$0xff]  }
 0x6f5   : > { %3477 = vmatmul.mubr.msk.bf16.vlgmr.msra.gmra.mrb[32].mxu1 %vm1848_vm2, %v1896_v28 }
 0x6f6   : > { %3496 = vmatprep.mubr.msk.bf16.mxu1 %vm4660_vm1, %v4657_v2  ;;  %3481 = vmatpush3.bf16.msra.mxu1 %v3863_v14 }
 0x6f7   : > { %3482 = vmatprep.subr.bf16.mxu1 %v4657_v2 }
 0x6fa   : > { %3483 = vmatpush3.bf16.msra.mxu1 %v3864_v15 }
 0x6fb   : > { %3484 = vmatprep.subr.bf16.mxu1 %v4657_v2 }
 0x6fe   : > { %3485 = vmatpush3.bf16.msra.mxu1 %v3865_v22 }
 0x6ff   : > { %3486 = vmatprep.subr.bf16.mxu1 %v4657_v2 }
 0x702   : > { %3487 = vmatpush3.bf16.msra.mxu1 %v3866_v23 }
 0x703   : > { %3488 = vmatprep.subr.bf16.mxu1 %v4657_v2 }
 0x706   : > { %3489 = vmatpush3.bf16.msra.mxu1 %v3867_v24 }
 0x707   : > { %3490 = vmatprep.subr.bf16.mxu1 %v4657_v2 }
 0x70a   : > { %3491 = vmatpush3.bf16.msra.mxu1 %v3868_v25 }
 0x70b   : > { %3492 = vmatprep.subr.bf16.mxu1 %v4657_v2 }
 0x70e   : > { %3493 = vmatpush3.bf16.msra.mxu1 %v3869_v26 }
 0x70f   : > { %3494 = vmatprep.subr.bf16.mxu1 %v4657_v2 }
 0x712   : > { %3495 = vmatpush3.bf16.msra.mxu1 %v3870_v27 }
 0x7b0   : > { %v1938_v43 = vpop.f32.mrb[20].mxu1 }
 0x7b1   : > { %v3460_v44 = vpop.f32.mrb[21].mxu1 }
 0x7b2   : > { %v1941_v45 = vpop.f32.mrb[22].mxu1 }
 0x7b3   : > { %v3461_v46 = vpop.f32.mrb[23].mxu1  ;;  %v3871_v45 = vld [vmem:[%s5398_s0] sm:$0xff]  }
 0x7b4   : > { %v3872_v46 = vld [vmem:[%s5398_s0 + $0x8] sm:$0xff]  }
 0x7b8   : > { %v1984_v47 = vpop.f32.mrb[24].mxu1 }
 0x7b9   : > { %v2082_v48 = vpack.c.bf16 %v1984_v47, %v1938_v43  ;;  %v3466_v49 = vpop.f32.mrb[25].mxu1  ;;  %v3873_v47 = vld [vmem:[%s5398_s0 + $0x10] sm:$0xff]  }
 0x7ba   : > { %v1987_v50 = vpop.f32.mrb[26].mxu1  ;;  %v3875_v49 = vld [vmem:[%s5398_s0 + $0x20] sm:$0xff]  }
 0x7bb   : > { %v3467_v51 = vpop.f32.mrb[27].mxu1  ;;  %v3876_v50 = vld [vmem:[%s5398_s0 + $0x28] sm:$0xff]  }
 0x7bc   : > { %v3877_v51 = vld [vmem:[%s5398_s0 + $0x30] sm:$0xff]  }
 0x7c0   : > { %v2030_v52 = vpop.f32.mrb[28].mxu1 }
 0x7c1   : > { %v3472_v53 = vpop.f32.mrb[29].mxu1 }
 0x7c2   : > { %v2033_v54 = vpop.f32.mrb[30].mxu1  ;;  %v3310_v53 = vld [vmem:[%s972_s19] ss:$0 sm:$0xff] }
 0x7c3   : > { %v3473_v55 = vpop.f32.mrb[31].mxu1 }
 0x7c8   : > { %v2076_v56 = vpop.f32.mrb[32].mxu1 }
 0x7c9   : > { %v2083_v57 = vpack.c.bf16 %v2076_v56, %v2030_v52  ;;  %v3478_v58 = vpop.f32.mrb[33].mxu1  ;;  %v3878_v52 = vld [vmem:[%s5398_s0 + $0x38] sm:$0xff]  }
 0x7ca   : > { %v2079_v59 = vpop.f32.mrb[34].mxu1 }
 0x7cb   : > { %v3479_v60 = vpop.f32.mrb[35].mxu1  ;;  %2251 = vmatprep.mubr.bf16.mxu0 %v2083_v57 }
 0x7cc   : > { %2252 = vmatmul.mubr.bf16.vlgmr.msra.gmra.mrb[8].mxu0 %v2082_v48  ;;  %v3874_v48 = vld [vmem:[%s5398_s0 + $0x18] sm:$0xff]  }
 0x7cd   : > { %3516 = vmatprep.mubr.msk.bf16.mxu0 %vm4660_vm1, %v4657_v2  ;;  %3501 = vmatpush3.bf16.msra.mxu0 %v3871_v45 }
 0x7ce   : > { %3502 = vmatprep.subr.bf16.mxu0 %v4657_v2 }
 0x7d1   : > { %3503 = vmatpush3.bf16.msra.mxu0 %v3872_v46 }
 0x7d2   : > { %3504 = vmatprep.subr.bf16.mxu0 %v4657_v2 }
 0x7d5   : > { %3505 = vmatpush3.bf16.msra.mxu0 %v3873_v47 }
 0x7d6   : > { %3506 = vmatprep.subr.bf16.mxu0 %v4657_v2 }
 0x7d9   : > { %3507 = vmatpush3.bf16.msra.mxu0 %v3874_v48 }
 0x7da   : > { %3508 = vmatprep.subr.bf16.mxu0 %v4657_v2 }
 0x7dd   : > { %3509 = vmatpush3.bf16.msra.mxu0 %v3875_v49 }
 0x7de   : > { %3510 = vmatprep.subr.bf16.mxu0 %v4657_v2 }
 0x7e1   : > { %3511 = vmatpush3.bf16.msra.mxu0 %v3876_v50  ;;  %v3907_v50 = vld [vmem:[#allocation22] sm:$0xff] (!%p3330_p13)  }
 0x7e2   : > { %3512 = vmatprep.subr.bf16.mxu0 %v4657_v2 }
 0x7e5   : > { %3513 = vmatpush3.bf16.msra.mxu0 %v3877_v51  ;;  %v4661_v51 = vmov (!%p3330_p13), 0.0  }
 0x7e6   : > { %3514 = vmatprep.subr.bf16.mxu0 %v4657_v2  ;;  %3540 = vmatprep.subr.bf16.mxu1 (!%p3330_p13), %v4661_v51 }
 0x7e9   : > { %3515 = vmatpush3.bf16.msra.mxu0 %v3878_v52  ;;  %v3908_v52 = vld [vmem:[#allocation22 + $0x8] sm:$0xff] (!%p3330_p13)  }
 0x7ea   : > { %3520 = vmatprep.subr.bf16.mxu0 (!%p3330_p13), %v4661_v51 }
 0x89f   : > { %v3390_v61 = vpop.f32.mrb[8].mxu0 }
 0x8a0   : > { %v3391_v63 = vpop.f32.mrb[9].mxu0 }
 0x8a1   : > { %v3392_v5 = vadd.f32 %v3391_v63, %v3390_v61  ;;  %v3393_v6 = vpop.f32.mrb[10].mxu0 }
 0x8a2   : > { %v3394_v9 = vpop.f32.mrb[11].mxu0 }
 0x8a3   : > { %v2254_v11 = vadd.f32 %v3392_v5, %v3291_v62  ;;  %v3395_v12 = vadd.f32 %v3394_v9, %v3393_v6 }
 0x8a5   : > { %v2257_v8 = vadd.f32 %v3395_v12, %v3291_v62  ;;  %v2260_v13 = vadd.f32 %v2254_v11, %v5459_v1 }
 0x8a7   : > { %2264 = vadd.xlane.f32.xlu0 %v2260_v13  ;;  %v2261_v10 = vadd.f32 %v2257_v8, %v5461_v4 }
 0x8a9   : > { %2266 = vadd.xlane.f32.xlu1 %v2261_v10 }
 0x934   : > { %v2265_v7 = vpop.xlane.xlu0 %2264 }
 0x935   : > { %v2268_v16 = vmul.f32 0.03125, %v2265_v7 }
 0x936   : > { %v2267_v17 = vpop.xlane.xlu1 %2266 }
 0x937   : > { %v2270_v18 = vsub.f32 %v2260_v13, %v2268_v16  ;;  %v2269_v1 = vmul.f32 0.03125, %v2267_v17 }
 0x939   : > { %v2272_v19 = vmul.f32 %v5421_v3, %v2270_v18  ;;  %v2271_v4 = vsub.f32 %v2261_v10, %v2269_v1  ;;  %v3319_v1 = vld [vmem:[%s989_s7] ss:$0 sm:$0xff] }
 0x93b   : > { %v2273_v20 = vmul.f32 %v5421_v3, %v2271_v4  ;;  %v2274_v21 = vmul.f32 %v2272_v19, %v2272_v19 }
 0x93d   : > { %2276 = vadd.xlane.f32.xlu0 %v2274_v21  ;;  %v2275_v0 = vmul.f32 %v2273_v20, %v2273_v20 }
 0x93f   : > { %2278 = vadd.xlane.f32.xlu1 %v2275_v0 }
 0x9ca   : > { %v2277_v28 = vpop.xlane.xlu0 %2276 }
 0x9cb   : > { %v2280_v29 = vmul.f32 0.03125, %v2277_v28 }
 0x9cc   : > { %v2279_v30 = vpop.xlane.xlu1 %2278 }
 0x9cd   : > { %v2282_v31 = vadd.f32 1e-12, %v2280_v29  ;;  %v2281_v32 = vmul.f32 0.03125, %v2279_v30 }
 0x9cf   : > { %3895 = vrsqrt.f32 %v2282_v31  ;;  %v2283_v33 = vadd.f32 1e-12, %v2281_v32 }
 0x9d1   : > { %3897 = vrsqrt.f32 %v2283_v33 }
 0x9d9   : > { %v3896_v34 = vpop.eup %3895 }
 0x9da   : > { %v2286_v36 = vmul.f32 %v3896_v34, %v2272_v19 }
 0x9db   : > { %v3898_v37 = vpop.eup %3897 }
 0x9dc   : > { %v2287_v38 = vmul.f32 %v3898_v37, %v2273_v20  ;;  %v2294_v39 = vmul.f32 %v3308_v35, %v2286_v36 }
 0x9de   : > { %v2295_v41 = vmul.f32 %v3308_v35, %v2287_v38  ;;  %v5594_v42 = vadd.f32 %v3309_v40, %v2294_v39 }
 0x9e0   : > { %v5596_v43 = vadd.f32 %v3309_v40, %v2295_v41 }
 0x9e2   : > { %v2304_v44 = vpack.c.bf16 %v5596_v43, %v5594_v42 }
 0x9e4   : > { %3497 = vmatmul.mubr.bf16.vlgmr.msra.gmra.mrb[36].mxu1 %v2304_v44 }
 0x9e5   : > { %3556 = vmatprep.mubr.msk.bf16.mxu1 (!%p3330_p13), %vm4662_vm4, %v4661_v51 }
 0xab7   : > { %v2410_v54 = vpop.f32.mrb[36].mxu1 }
 0xab8   : > { %v2411_v55 = vadd.f32 %v3310_v53, %v2410_v54  ;;  %v3498_v56 = vpop.f32.mrb[37].mxu1  ;;  %v3915_v54 = vld [vmem:[#allocation25] sm:$0xff] (!%p3330_p13)  }
 0xab9   : > { %v2413_v57 = vpop.f32.mrb[38].mxu1  ;;  %3541 = vmatpush3.bf16.msra.mxu1 (!%p3330_p13), %v3915_v54  ;;  %v3916_v56 = vld [vmem:[#allocation25 + $0x8] sm:$0xff] (!%p3330_p13)  }
 0xaba   : > { %v2419_v58 = vmul.f32 0.044715, %v2411_v55  ;;  %v2414_v59 = vadd.f32 %v3310_v53, %v2413_v57  ;;  %v3499_v60 = vpop.f32.mrb[39].mxu1  ;;  %v2417_v14 = vmul.f32 0.5, %v2411_v55  ;;  %v3909_v53 = vld [vmem:[#allocation22 + $0x10] sm:$0xff] (!%p3330_p13)   ;;  %3542 = vmatprep.subr.bf16.mxu1 (!%p3330_p13), %v4661_v51  ;;  %v3911_v57 = vld [vmem:[#allocation22 + $0x20] sm:$0xff] (!%p3330_p13)  }
 0xabb   : > { %v3912_v60 = vld [vmem:[#allocation22 + $0x28] sm:$0xff] (!%p3330_p13)  }
 0xabc   : > { %v2421_v61 = vmul.f32 %v2419_v58, %v2411_v55  ;;  %v2420_v62 = vmul.f32 0.044715, %v2414_v59  ;;  %v2418_v15 = vmul.f32 0.5, %v2414_v59  ;;  %v3917_v58 = vld [vmem:[#allocation25 + $0x10] sm:$0xff] (!%p3330_p13)  }
 0xabd   : > { %3543 = vmatpush3.bf16.msra.mxu1 (!%p3330_p13), %v3916_v56 }
 0xabe   : > { %v2423_v63 = vmul.f32 %v2421_v61, %v2411_v55  ;;  %v2422_v5 = vmul.f32 %v2420_v62, %v2414_v59  ;;  %3544 = vmatprep.subr.bf16.mxu1 (!%p3330_p13), %v4661_v51 }
 0xac0   : > { %v2425_v6 = vadd.f32 %v2423_v63, %v2411_v55  ;;  %v2424_v9 = vmul.f32 %v2422_v5, %v2414_v59  ;;  %v3910_v55 = vld [vmem:[#allocation22 + $0x18] sm:$0xff] (!%p3330_p13)   ;;  %v3913_v5 = vld [vmem:[#allocation22 + $0x30] sm:$0xff] (!%p3330_p13)  }
 0xac1   : > { %3545 = vmatpush3.bf16.msra.mxu1 (!%p3330_p13), %v3917_v58  ;;  %v3918_v63 = vld [vmem:[#allocation25 + $0x18] sm:$0xff] (!%p3330_p13)  }
 0xac2   : > { %v2427_v11 = vmul.f32 0.7978846, %v2425_v6  ;;  %v2426_v12 = vadd.f32 %v2424_v9, %v2414_v59  ;;  %3546 = vmatprep.subr.bf16.mxu1 (!%p3330_p13), %v4661_v51 }
 0xac4   : > { %3899 = vtanh.f32 %v2427_v11  ;;  %v2428_v2 = vmul.f32 0.7978846, %v2426_v12  ;;  %v3914_v11 = vld [vmem:[#allocation22 + $0x38] sm:$0xff] (!%p3330_p13)  }
 0xac5   : > { %3547 = vmatpush3.bf16.msra.mxu1 (!%p3330_p13), %v3918_v63 }
 0xac6   : > { %3901 = vtanh.f32 %v2428_v2  ;;  %3548 = vmatprep.subr.bf16.mxu1 (!%p3330_p13), %v4661_v51 }
 0xace   : > { %v3900_v8 = vpop.eup %3899 }
 0xacf   : > { %v2431_v13 = vadd.f32 1.0, %v3900_v8  ;;  %v3919_v8 = vld [vmem:[#allocation25 + $0x20] sm:$0xff] (!%p3330_p13)  }
 0xad0   : > { %v3902_v10 = vpop.eup %3901  ;;  %3549 = vmatpush3.bf16.msra.mxu1 (!%p3330_p13), %v3919_v8 }
 0xad1   : > { %v2432_v7 = vadd.f32 1.0, %v3902_v10  ;;  %v2433_v16 = vmul.f32 %v2431_v13, %v2417_v14  ;;  %3550 = vmatprep.subr.bf16.mxu1 (!%p3330_p13), %v4661_v51  ;;  %v3920_v13 = vld [vmem:[#allocation25 + $0x28] sm:$0xff] (!%p3330_p13)   ;;  %v3921_v10 = vld [vmem:[#allocation25 + $0x30] sm:$0xff] (!%p3330_p13)   ;;  %v3922_v14 = vld [vmem:[#allocation25 + $0x38] sm:$0xff] (!%p3330_p13)  }
 0xad3   : > { %v2434_v17 = vmul.f32 %v2432_v7, %v2418_v15  ;;  %v3331_v15 = vld [vmem:[#allocation23] ss:$0 sm:$0xff] (!%p3330_p13) }
 0xad4   : > { %3551 = vmatpush3.bf16.msra.mxu1 (!%p3330_p13), %v3920_v13 }
 0xad5   : > { %v2435_v18 = vpack.c.bf16 %v2434_v17, %v2433_v16  ;;  %3552 = vmatprep.subr.bf16.mxu1 (!%p3330_p13), %v4661_v51 }
 0xad7   : > { %3517 = vmatmul.mubr.bf16.vlgmr.msra.gmra.mrb[12].mxu0 %v2435_v18 }
 0xad8   : > { %3521 = vmatpush3.bf16.msra.mxu0 (!%p3330_p13), %v3907_v50  ;;  %3536 = vmatprep.mubr.msk.bf16.mxu0 (!%p3330_p13), %vm4662_vm4, %v4661_v51 }
 0xad9   : > { %3522 = vmatprep.subr.bf16.mxu0 (!%p3330_p13), %v4661_v51  ;;  %3553 = vmatpush3.bf16.msra.mxu1 (!%p3330_p13), %v3921_v10 }
 0xada   : > { %3554 = vmatprep.subr.bf16.mxu1 (!%p3330_p13), %v4661_v51 }
 0xadc   : > { %3523 = vmatpush3.bf16.msra.mxu0 (!%p3330_p13), %v3908_v52 }
 0xadd   : > { %3524 = vmatprep.subr.bf16.mxu0 (!%p3330_p13), %v4661_v51  ;;  %3555 = vmatpush3.bf16.msra.mxu1 (!%p3330_p13), %v3922_v14 }
 0xae0   : > { %3525 = vmatpush3.bf16.msra.mxu0 (!%p3330_p13), %v3909_v53 }
 0xae1   : > { %3526 = vmatprep.subr.bf16.mxu0 (!%p3330_p13), %v4661_v51 }
 0xae4   : > { %3527 = vmatpush3.bf16.msra.mxu0 (!%p3330_p13), %v3910_v55 }
 0xae5   : > { %3528 = vmatprep.subr.bf16.mxu0 (!%p3330_p13), %v4661_v51 }
 0xae8   : > { %3529 = vmatpush3.bf16.msra.mxu0 (!%p3330_p13), %v3911_v57 }
 0xae9   : > { %3530 = vmatprep.subr.bf16.mxu0 (!%p3330_p13), %v4661_v51 }
 0xaec   : > { %3531 = vmatpush3.bf16.msra.mxu0 (!%p3330_p13), %v3912_v60 }
 0xaed   : > { %3532 = vmatprep.subr.bf16.mxu0 (!%p3330_p13), %v4661_v51 }
 0xaf0   : > { %3533 = vmatpush3.bf16.msra.mxu0 (!%p3330_p13), %v3913_v5 }
 0xaf1   : > { %3534 = vmatprep.subr.bf16.mxu0 (!%p3330_p13), %v4661_v51 }
 0xaf4   : > { %3535 = vmatpush3.bf16.msra.mxu0 (!%p3330_p13), %v3914_v11 }
 0xbaa   : > { %v2541_v19 = vpop.f32.mrb[12].mxu0 }
 0xbab   : > { %v2542_v4 = vadd.f32 %v3319_v1, %v2541_v19  ;;  %v3518_v20 = vpop.f32.mrb[13].mxu0 }
 0xbac   : > { %v2544_v21 = vpop.f32.mrb[14].mxu0  ;;  %v3340_v20 = vld [vmem:[#allocation26] ss:$0 sm:$0xff] (!%p3330_p13) }
 0xbad   : > { %v2545_v0 = vadd.f32 %v3319_v1, %v2544_v21  ;;  %v3519_v22 = vpop.f32.mrb[15].mxu0  ;;  %v2548_v23 = vadd.f32 %v2542_v4, %v5594_v42  ;;  %v3328_v42 = vld [vmem:[%s997_s25] ss:$0 sm:$0xff] }
 0xbaf   : > { %2552 = vadd.xlane.f32.xlu0 %v2548_v23  ;;  %v2549_v24 = vadd.f32 %v2545_v0, %v5596_v43 }
 0xbb1   : > { %2554 = vadd.xlane.f32.xlu1 %v2549_v24 }
 0xc3c   : > { %v2553_v25 = vpop.xlane.xlu0 %2552 }
 0xc3d   : > { %v2556_v26 = vmul.f32 0.03125, %v2553_v25 }
 0xc3e   : > { %v2555_v27 = vpop.xlane.xlu1 %2554 }
 0xc3f   : > { %v2558_v28 = vsub.f32 %v2548_v23, %v2556_v26  ;;  %v2557_v29 = vmul.f32 0.03125, %v2555_v27 }
 0xc41   : > { %v2560_v30 = vmul.f32 %v5421_v3, %v2558_v28  ;;  %v2559_v31 = vsub.f32 %v2549_v24, %v2557_v29 }
 0xc43   : > { %v2561_v32 = vmul.f32 %v5421_v3, %v2559_v31  ;;  %v2562_v33 = vmul.f32 %v2560_v30, %v2560_v30  ;;  %v3329_v3 = vld [vmem:[%s1005_s18] ss:$0 sm:$0xff] }
 0xc45   : > { %2564 = vadd.xlane.f32.xlu0 %v2562_v33  ;;  %v2563_v34 = vmul.f32 %v2561_v32, %v2561_v32 }
 0xc47   : > { %2566 = vadd.xlane.f32.xlu1 %v2563_v34 }
 0xcd2   : > { %v2565_v35 = vpop.xlane.xlu0 %2564 }
 0xcd3   : > { %v2568_v36 = vmul.f32 0.03125, %v2565_v35 }
 0xcd4   : > { %v2567_v37 = vpop.xlane.xlu1 %2566 }
 0xcd5   : > { %v2570_v38 = vadd.f32 1e-12, %v2568_v36  ;;  %v2569_v39 = vmul.f32 0.03125, %v2567_v37 }
 0xcd7   : > { %3903 = vrsqrt.f32 %v2570_v38  ;;  %v2571_v40 = vadd.f32 1e-12, %v2569_v39 }
 0xcd9   : > { %3905 = vrsqrt.f32 %v2571_v40 }
 0xce1   : > { %v3904_v41 = vpop.eup %3903 }
 0xce2   : > { %v2574_v43 = vmul.f32 %v3904_v41, %v2560_v30 }
 0xce3   : > { %v3906_v44 = vpop.eup %3905 }
 0xce4   : > { %v2582_v45 = vmul.f32 %v3328_v42, %v2574_v43  ;;  %v2575_v46 = vmul.f32 %v3906_v44, %v2561_v32  ;;  %2597 = sbr.rel (%p3330_p13) target bundleno = 3757 (0xead), region = 188 }
 0xce6   : > { %v2590_v47 = vadd.f32 %v3329_v3, %v2582_v45  ;;  %v2583_v48 = vmul.f32 %v3328_v42, %v2575_v46 }
 0xce8   : > { %2592 = vst [vmem:[#allocation28] sm:$0xff] %v2590_v47  ;;  %v2591_v49 = vadd.f32 %v3329_v3, %v2583_v48  ;;  %v2598_v61 = vpack.c.bf16 (!%p3330_p13), %v2590_v47, %v2590_v47 }
 0xcea   : > { %2593 = vst [vmem:[#allocation28 + $0x8] sm:$0xff] %v2591_v49  ;;  %v2599_v59 = vpack.c.bf16 (!%p3330_p13), %v2591_v49, %v2591_v49  ;;  %v2625_v6 = vunpack.c.l.b16 (!%p3330_p13), %v2598_v61 }
 0xcec   : > { %v2626_v62 = vunpack.c.l.b16 %v2599_v59 }
 0xcee   : > { %v2627_v9 = vrot.slane %v2626_v62, 7 }
 0xcf0   : > { %v2629_v12 = vsel %vm2628_vm5, %v2627_v9, %v2625_v6 }
 0xcf1   : > { %v2630_v2 = vpack.c.b16 %v2629_v12, %v2629_v12 }
 0xcf3   : > { %3537 = vmatmul.mubr.bf16.vlgmr.msra.gmra.mrb[0].mxu0 %v2630_v2 }
 0xdc6   : > { %v2714_v7 = vpop.f32.mrb[0].mxu0 }
 0xdc7   : > { %v2715_v16 = vadd.f32 %v3331_v15, %v2714_v7  ;;  %v3538_v17 = vpop.f32.mrb[1].mxu0 }
 0xdc8   : > { %v2717_v18 = vpop.f32.mrb[2].mxu0 }
 0xdc9   : > { %3923 = vtanh.f32 %v2715_v16  ;;  %v3539_v1 = vpop.f32.mrb[3].mxu0 }
 0xdd3   : > { %v3924_v19 = vpop.eup %3923 }
 0xdd4   : > { %v2721_v4 = vpack.c.bf16 %v3924_v19, %v3924_v19 }
 0xdd6   : > { %3557 = vmatmul.mubr.bf16.vlgmr.msra.gmra.mrb[0].mxu1 %v2721_v4 }
 0xea9   : > { %v2827_v21 = vpop.f32.mrb[0].mxu1 }
 0xeaa   : > { %v2828_v0 = vadd.f32 %v3340_v20, %v2827_v21  ;;  %v3558_v22 = vpop.f32.mrb[1].mxu1 }
 0xeab   : > { %v2830_v23 = vpop.f32.mrb[2].mxu1 }
 0xeac   : > { %2833 = vst [vmem:[#allocation29] sm:$0x3] %v2828_v0  ;;  %v3559_v24 = vpop.f32.mrb[3].mxu1 }
 0xead PF: > { %s5848_s24 = sld [smem:[#allocation42_spill]]  ;;  %s4663_s5 = smov [#allocation28]  }
 0xeae   : > { %s2840_s1 = sshll.u32 %s4663_s5, 4  ;;  %s2841_s1 = int_to_ptr.vmem [resolvable:$true] %s2840_s1 }
 0xeaf   : > { %s4509_s22 = scalar_lea.vmem %s2841_s1, 256  ;;  %p4516_p12 = scmp.lt.s32.totalorder %s2841_s1, %s2841_s1 }
 0xeb0   : > { %p4510_p10 = scmp.ne.s32.totalorder %s2841_s1, %s4509_s22  ;;  %p4517_p3 = scmp.lt.s32.totalorder %s4509_s22, %s4509_s22 }
 0xeb2   : > { %p4518_p0 = por %p4517_p3, %p4516_p12 }
 0xeb3   : > { %p3709_p7 = scmp.eq.s32.totalorder %s5848_s24, 1 }
 0xeb5   : > { %p4511_p9 = pnand %p4510_p10, %p3709_p7 }
 0xeb7   : > { %p4512_p4 = pneg %p4511_p9 }
 0xeb9   : > { %p4519_p5 = pnand %p4518_p0, %p4512_p4 }
 0xebb   : > { %4522 = shalt.err (!%p4519_p5)
}
 0xebc   : > { %s5849_s13 = sld [smem:[#allocation66_spill]] }
 0xec2   : > { %s4523_s26 = scalar_lea.hbm %s5849_s13, 256 }
 0xec3   : > { %p4524_p6 = scmp.ne.s32.totalorder %s5849_s13, %s4523_s26  ;;  %p4529_p8 = scmp.lt.u32.totalorder %s4523_s26, %s5849_s13 }
 0xec5   : > { %p4525_p1 = pnand %p4524_p6, %p3709_p7 }
 0xec7   : > { %p4526_p2 = pneg %p4525_p1 }
 0xec9   : > { %p4531_p11 = pnand %p4529_p8, %p4526_p2 }
 0xecb   : > { %4534 = shalt.err (!%p4531_p11)
}
 0xecc   : > { %s4664_s2 = smov 128   ;;  %s4665_s9 = smov 8  }
 0xecd   : > { %3623 = dma.vmem_to_hbm [thread:$0]  (%p3709_p7), %s2841_s1, 256, %s5849_s13, [#allocation4], %s4664_s2, %s4664_s2, %s4665_s9  }
 0xece   : > { %s4666_s4 = smov [#allocation29]  }
 0xecf   : > { %s2854_s19 = sshll.u32 %s4666_s4, 4  ;;  %s2855_s19 = int_to_ptr.vmem [resolvable:$true] %s2854_s19 }
 0xed0   : > { %s4535_s0 = scalar_lea.vmem %s2855_s19, 32  ;;  %p4542_p4 = scmp.lt.s32.totalorder %s2855_s19, %s2855_s19 }
 0xed1   : > { %p4536_p13 = scmp.ne.s32.totalorder %s2855_s19, %s4535_s0  ;;  %p4543_p12 = scmp.lt.s32.totalorder %s4535_s0, %s4535_s0 }
 0xed3   : > { %p4537_p10 = pnand %p4536_p13, %p3709_p7  ;;  %p4544_p3 = por %p4543_p12, %p4542_p4 }
 0xed5   : > { %p4538_p9 = pneg %p4537_p10 }
 0xed7   : > { %p4545_p0 = pnand %p4544_p3, %p4538_p9 }
 0xed9   : > { %4548 = shalt.err (!%p4545_p0)
}
 0xeda   : > { %s5850_s18 = sld [smem:[#allocation67_spill]] }
 0xee0   : > { %s4549_s27 = scalar_lea.hbm %s5850_s18, 32 }
 0xee1   : > { %p4550_p5 = scmp.ne.s32.totalorder %s5850_s18, %s4549_s27  ;;  %p4555_p2 = scmp.lt.u32.totalorder %s4549_s27, %s5850_s18 }
 0xee3   : > { %p4551_p6 = pnand %p4550_p5, %p3709_p7 }
 0xee5   : > { %p4552_p1 = pneg %p4551_p6 }
 0xee7   : > { %p4557_p8 = pnand %p4555_p2, %p4552_p1 }
 0xee9   : > { %4560 = shalt.err (!%p4557_p8)
}
 0xeea   : > { %3625 = dma.vmem_to_hbm [thread:$0]  (%p3709_p7), %s2855_s19, 32, %s5850_s18, [#allocation30]  }
 0xeeb   : > { %4606 = dma.done.wait (%p3709_p7), [#allocation4], 256  }
 0xeec   : > { %4608 = vsyncadd (%p3709_p7), [#allocation4], 4294967040 }
 0xeed   : > { %4610 = dma.done.wait (%p3709_p7), [#allocation30], 32  }
 0xeee   : > { %4612 = vsyncadd (%p3709_p7), [#allocation30], 4294967264 }
 0xeef PF: > { %s5851_s27 = sld [smem:[#allocation45_spill]]  ;;  %s5852_s2 = sld [smem:[#allocation40_spill]] }
 0xef0   : > { %s5853_s25 = sld [smem:[#allocation41_spill]]  ;;  %s5854_s26 = sld [smem:[#allocation46_spill]] }
 0xef5   : > { %p36_p11 = scmp.ge.s32.totalorder %s5851_s27, 4  }
 0xef7   :  { %38 = sbr.rel (!%p36_p11) target bundleno = 30 (0x1e), region = 305 }
 0xefe   :  { %2871 = vsyncpa [#allocation3], 1 }
 0xeff   :  { %2873 = vsyncpa [#allocation3 + $0x1], 1 }
 0xf00   :  { %2874 = vsyncpa [#allocation6], 1 }
 0xf01   :  { %2875 = vsyncpa [#allocation21], 1 }
 0xf02   :  { %2876 = vsyncpa [#allocation24], 1 }
 0xf03   :  { %2877 = vsyncpa [#allocation27], 1 }
 0xf04   :  { %2878 = vsyncpa [#allocation4], 1 }
 0xf05   :  { %2880 = vsyncpa [#allocation4 + $0x1], 1 }
 0xf06   :  { %2881 = vsyncpa [#allocation30], 1 }

</bundles_post_ra>
